<compile_context>
chip_gen: v7x
topology: tpu7x:2x2x1
jax: 0.10.0
libtpu: 0.0.40
codegen_flags: <defaults>
</compile_context>

<pallas_src>
import functools

import jax
import jax.numpy as jnp
import numpy as np
from jax import lax
from jax.experimental import pallas as pl
from jax.experimental.pallas import tpu as pltpu

KSIZE = 7
PAD = 3


# ------------------------------- fused LightCBAM kernel ------------------------------- #
def _light_cbam_kernel(x_ref, w1t_ref, w2_ref, wc_ref, o_ref,
                       pad_ref, row_ref, sa2d_ref, *, H, W):
    # x_ref:   (1, C, HW) VMEM, lane-dense (HW on lanes)
    # w1t_ref: (C, hidden) VMEM   (transposed first 1x1-conv weight)
    # w2_ref:  (C, hidden) VMEM   (second 1x1-conv weight)
    # wc_ref:  (7, 7) SMEM        (7x7 spatial conv weight, read as scalars)
    # o_ref:   (1, C, HW) VMEM
    # pad_ref: (H+2*PAD, W+2*PAD) VMEM scratch (zero-padded spatial map)
    # row_ref: (1, HW) VMEM scratch (flattened spatial row, reused for s and sa)
    # sa2d_ref:(H, W)  VMEM scratch (spatial attention map in 2-D layout)
    x = x_ref[0].astype(jnp.float32)                                   # (C, HW)

    # ---------------- LightChannelAttention ----------------
    # x_pool = 0.5 * (mean(x, HW) + max(x, HW))   per channel   (lane reductions -> XLU)
    pool = 0.5 * (jnp.mean(x, axis=1, keepdims=True)
                  + jnp.max(x, axis=1, keepdims=True))                 # (C, 1)
    # 1x1-conv MLP on the VPU (broadcast-mul + reduce); a (2x32) matvec would waste the
    # full MXU pipeline latency for 64 MACs.
    w1t = w1t_ref[...].astype(jnp.float32)                             # (C, hidden)
    w2 = w2_ref[...].astype(jnp.float32)                               # (C, hidden)
    h = jnp.maximum(jnp.sum(w1t * pool, axis=0, keepdims=True), 0.0)   # (1, hidden)
    a = jnp.sum(w2 * h, axis=1, keepdims=True)                         # (C, 1)
    ca = 1.0 / (1.0 + jnp.exp(-a))                                     # sigmoid (exp -> EUP)
    x_ca = x * ca                                                      # (C, HW), stays in vregs

    # ---------------- LightSpatialAttention ----------------
    # 0.5 * (mean over channels + max over channels), lane-dense row (sublane reductions)
    s = 0.5 * (jnp.mean(x_ca, axis=0, keepdims=True)
               + jnp.max(x_ca, axis=0, keepdims=True))                 # (1, HW)

    # (1, HW) -> zero-padded (H+6, W+6) scratch via tiny ref row copies (no lane-dim reshape).
    row_ref[...] = s
    pad_ref[...] = jnp.zeros((H + 2 * PAD, W + 2 * PAD), jnp.float32)
    for r in range(H):
        pad_ref[pl.ds(PAD + r, 1), pl.ds(PAD, W)] = row_ref[pl.ds(0, 1), pl.ds(r * W, W)]

    # 7x7 zero-padded cross-correlation (matches nn.Conv2d, padding=3, no bias).
    acc = jnp.zeros((H, W), jnp.float32)
    for dy in range(KSIZE):
        for dx in range(KSIZE):
            acc = acc + wc_ref[dy, dx] * pad_ref[pl.ds(dy, H), pl.ds(dx, W)]
    sa2d_ref[...] = 1.0 / (1.0 + jnp.exp(-acc))                        # sigmoid, (H, W)

    # (H, W) -> (1, HW) row for the lane-dense broadcast multiply and full-width store.
    for r in range(H):
        row_ref[pl.ds(0, 1), pl.ds(r * W, W)] = sa2d_ref[pl.ds(r, 1), pl.ds(0, W)]
    o_ref[0] = (x_ca * row_ref[...]).astype(o_ref.dtype)


# ------------------------------------------ wrapper ---------------------------------------- #
def light_cbam_attention(x, w1, w2, wconv):
    N, C, H, W = x.shape
    hidden = w1.shape[0]
    HW = H * W

    x2 = x.reshape(N, C, HW)          # lane-dense view (free host-side reshape, contiguous)
    w1t = w1.T                        # (C, hidden) so the kernel never transposes in VMEM

    kernel = functools.partial(_light_cbam_kernel, H=H, W=W)
    out2 = pl.pallas_call(
        kernel,
        out_shape=jax.ShapeDtypeStruct((N, C, HW), x.dtype),
        grid_spec=pltpu.PrefetchScalarGridSpec(
            num_scalar_prefetch=0,
            grid=(N,),
            in_specs=[
                pl.BlockSpec((1, C, HW), lambda n: (n, 0, 0)),
                pl.BlockSpec((C, hidden), lambda n: (0, 0)),
                pl.BlockSpec((C, hidden), lambda n: (0, 0)),
                pl.BlockSpec(memory_space=pltpu.MemorySpace.SMEM),
            ],
            out_specs=pl.BlockSpec((1, C, HW), lambda n: (n, 0, 0)),
            scratch_shapes=[
                pltpu.VMEM((H + 2 * PAD, W + 2 * PAD), jnp.float32),
                pltpu.VMEM((1, HW), jnp.float32),
                pltpu.VMEM((H, W), jnp.float32),
            ],
        ),
        compiler_params=pltpu.CompilerParams(dimension_semantics=("parallel",)),
    )(x2, w1t, w2, wconv)
    return out2.reshape(N, C, H, W)


# ------------------------------------- pure-JAX reference ---------------------------------- #
def _reference(x, w1, w2, wconv):
    pool = 0.5 * x.mean(axis=(2, 3), keepdims=True) + 0.5 * x.max(axis=(2, 3), keepdims=True)
    h = jnp.maximum(jnp.einsum('oc,ncab->noab', w1, pool, precision=lax.Precision.HIGHEST), 0.0)
    a = jnp.einsum('co,noab->ncab', w2, h, precision=lax.Precision.HIGHEST)
    x_ca = x * jax.nn.sigmoid(a)
    s = 0.5 * x_ca.mean(axis=1, keepdims=True) + 0.5 * x_ca.max(axis=1, keepdims=True)
    conv = lax.conv_general_dilated(
        s, wconv.reshape(1, 1, KSIZE, KSIZE), window_strides=(1, 1),
        padding=((PAD, PAD), (PAD, PAD)),
        dimension_numbers=('NCHW', 'OIHW', 'NCHW'),
        precision=lax.Precision.HIGHEST)
    return x_ca * jax.nn.sigmoid(conv)


if __name__ == "__main__":
    # LightCBAMAttention(in_planes=32, reduction_ratio=16, kernel_size=7)
    N, C, H, W = 2, 32, 16, 16
    reduction = 16
    hidden = C // reduction

    key = jax.random.PRNGKey(0)
    kx, k1, k2, kc = jax.random.split(key, 4)
    x = jax.random.normal(kx, (N, C, H, W), jnp.float32)
    # deterministic synthetic parameters (nn.Conv2d weights, no bias)
    w1 = jax.random.normal(k1, (hidden, C), jnp.float32) * (1.0 / np.sqrt(C))        # C -> hidden, 1x1
    w2 = jax.random.normal(k2, (C, hidden), jnp.float32) * (1.0 / np.sqrt(hidden))   # hidden -> C, 1x1
    wconv = jax.random.normal(kc, (KSIZE, KSIZE), jnp.float32) * (1.0 / KSIZE)       # 7x7, 1 -> 1

    out = jax.block_until_ready(light_cbam_attention(x, w1, w2, wconv))
    ref = jax.block_until_ready(_reference(x, w1, w2, wconv))
    np.testing.assert_allclose(np.asarray(out), np.asarray(ref), rtol=1e-3, atol=1e-4)
    print("KERNEL_OK")
</pallas_src>

<mosaic_0001>
module attributes {stable_mosaic.version = 11 : i64} {
  func.func @_light_cbam_kernel(%arg0: i32, %arg1: memref<1x32x256xf32, #tpu.memory_space<vmem>>, %arg2: memref<32x2xf32, #tpu.memory_space<vmem>>, %arg3: memref<32x2xf32, #tpu.memory_space<vmem>>, %arg4: memref<7x7xf32, #tpu.memory_space<smem>>, %arg5: memref<1x32x256xf32, #tpu.memory_space<vmem>>, %arg6: memref<22x22xf32, #tpu.memory_space<vmem>>, %arg7: memref<1x256xf32, #tpu.memory_space<vmem>>, %arg8: memref<16x16xf32, #tpu.memory_space<vmem>>) attributes {dimension_semantics = [#tpu.dimension_semantics<parallel>], iteration_bounds = array<i64: 2>, scalar_prefetch = 0 : i64, scratch_operands = 3 : i64, tpu.core_type = #tpu.core_type<tc>, window_params = [{transform_indices = @transform_0, window_bounds = array<i64: 1, 32, 256>}, {pipeline_mode = #tpu.pipeline_mode<synchronous>, transform_indices = @transform_1, window_bounds = array<i64: 32, 2>}, {pipeline_mode = #tpu.pipeline_mode<synchronous>, transform_indices = @transform_2, window_bounds = array<i64: 32, 2>}, {transform_indices = @transform_3, window_bounds = array<i64: 7, 7>}, {transform_indices = @transform_4, window_bounds = array<i64: 1, 32, 256>}]} {
    %c0 = arith.constant 0 : index
    %c0_0 = arith.constant 0 : index
    %c0_1 = arith.constant 0 : index
    %0 = vector.load %arg1[%c0, %c0_0, %c0_1] : memref<1x32x256xf32, #tpu.memory_space<vmem>>, vector<1x32x256xf32>
    %1 = vector.shape_cast %0 : vector<1x32x256xf32> to vector<32x256xf32>
    %cst = arith.constant dense<0.000000e+00> : vector<32xf32>
    %2 = vector.multi_reduction <add>, %1, %cst [1] : vector<32x256xf32> to vector<32xf32>
    %3 = vector.shape_cast %2 : vector<32xf32> to vector<32x1xf32>
    %cst_2 = arith.constant 2.560000e+02 : f32
    %4 = vector.broadcast %cst_2 : f32 to vector<32x1xf32>
    %5 = arith.divf %3, %4 : vector<32x1xf32>
    %cst_3 = arith.constant dense<0xFF800000> : vector<32xf32>
    %6 = vector.multi_reduction <maximumf>, %1, %cst_3 [1] : vector<32x256xf32> to vector<32xf32>
    %7 = vector.shape_cast %6 : vector<32xf32> to vector<32x1xf32>
    %8 = arith.addf %5, %7 : vector<32x1xf32>
    %cst_4 = arith.constant 5.000000e-01 : f32
    %9 = vector.broadcast %cst_4 : f32 to vector<32x1xf32>
    %10 = arith.mulf %9, %8 : vector<32x1xf32>
    %c0_5 = arith.constant 0 : index
    %c0_6 = arith.constant 0 : index
    %11 = vector.load %arg2[%c0_5, %c0_6] : memref<32x2xf32, #tpu.memory_space<vmem>>, vector<32x2xf32>
    %c0_7 = arith.constant 0 : index
    %c0_8 = arith.constant 0 : index
    %12 = vector.load %arg3[%c0_7, %c0_8] : memref<32x2xf32, #tpu.memory_space<vmem>>, vector<32x2xf32>
    %13 = vector.broadcast %10 : vector<32x1xf32> to vector<32x2xf32>
    %14 = arith.mulf %11, %13 : vector<32x2xf32>
    %cst_9 = arith.constant dense<0.000000e+00> : vector<2xf32>
    %15 = vector.multi_reduction <add>, %14, %cst_9 [0] : vector<32x2xf32> to vector<2xf32>
    %16 = vector.shape_cast %15 : vector<2xf32> to vector<1x2xf32>
    %cst_10 = arith.constant 0.000000e+00 : f32
    %17 = vector.broadcast %cst_10 : f32 to vector<1x2xf32>
    %18 = arith.maximumf %16, %17 : vector<1x2xf32>
    %19 = vector.broadcast %18 : vector<1x2xf32> to vector<32x2xf32>
    %20 = arith.mulf %12, %19 : vector<32x2xf32>
    %cst_11 = arith.constant dense<0.000000e+00> : vector<32xf32>
    %21 = vector.multi_reduction <add>, %20, %cst_11 [1] : vector<32x2xf32> to vector<32xf32>
    %22 = vector.shape_cast %21 : vector<32xf32> to vector<32x1xf32>
    %cst_12 = arith.constant 0.000000e+00 : f32
    %23 = vector.broadcast %cst_12 : f32 to vector<32x1xf32>
    %24 = arith.subf %23, %22 : vector<32x1xf32>
    %25 = math.exp %24 : vector<32x1xf32>
    %cst_13 = arith.constant 1.000000e+00 : f32
    %26 = vector.broadcast %cst_13 : f32 to vector<32x1xf32>
    %27 = arith.addf %26, %25 : vector<32x1xf32>
    %cst_14 = arith.constant 1.000000e+00 : f32
    %28 = vector.broadcast %cst_14 : f32 to vector<32x1xf32>
    %29 = arith.divf %28, %27 : vector<32x1xf32>
    %30 = vector.broadcast %29 : vector<32x1xf32> to vector<32x256xf32>
    %31 = arith.mulf %1, %30 : vector<32x256xf32>
    %cst_15 = arith.constant dense<0.000000e+00> : vector<256xf32>
    %32 = vector.multi_reduction <add>, %31, %cst_15 [0] : vector<32x256xf32> to vector<256xf32>
    %33 = vector.shape_cast %32 : vector<256xf32> to vector<1x256xf32>
    %cst_16 = arith.constant 3.200000e+01 : f32
    %34 = vector.broadcast %cst_16 : f32 to vector<1x256xf32>
    %35 = arith.divf %33, %34 : vector<1x256xf32>
    %cst_17 = arith.constant dense<0xFF800000> : vector<256xf32>
    %36 = vector.multi_reduction <maximumf>, %31, %cst_17 [0] : vector<32x256xf32> to vector<256xf32>
    %37 = vector.shape_cast %36 : vector<256xf32> to vector<1x256xf32>
    %38 = arith.addf %35, %37 : vector<1x256xf32>
    %cst_18 = arith.constant 5.000000e-01 : f32
    %39 = vector.broadcast %cst_18 : f32 to vector<1x256xf32>
    %40 = arith.mulf %39, %38 : vector<1x256xf32>
    %c0_19 = arith.constant 0 : index
    %c0_20 = arith.constant 0 : index
    %41 = vector.load %arg7[%c0_19, %c0_20] : memref<1x256xf32, #tpu.memory_space<vmem>>, vector<1x256xf32>
    tpu.vector_store %arg7[%c0_19, %c0_20], %40 {strides = array<i32>} : memref<1x256xf32, #tpu.memory_space<vmem>>, vector<1x256xf32>,
    %cst_21 = arith.constant 0.000000e+00 : f32
    %42 = vector.broadcast %cst_21 : f32 to vector<22x22xf32>
    %c0_22 = arith.constant 0 : index
    %c0_23 = arith.constant 0 : index
    %43 = vector.load %arg6[%c0_22, %c0_23] : memref<22x22xf32, #tpu.memory_space<vmem>>, vector<22x22xf32>
    tpu.vector_store %arg6[%c0_22, %c0_23], %42 {strides = array<i32>} : memref<22x22xf32, #tpu.memory_space<vmem>>, vector<22x22xf32>,
    %c0_24 = arith.constant 0 : index
    %c0_25 = arith.constant 0 : index
    %44 = vector.load %arg7[%c0_24, %c0_25] : memref<1x256xf32, #tpu.memory_space<vmem>>, vector<1x16xf32>
    %c3 = arith.constant 3 : index
    %c3_26 = arith.constant 3 : index
    %45 = vector.load %arg6[%c3, %c3_26] : memref<22x22xf32, #tpu.memory_space<vmem>>, vector<1x16xf32>
    tpu.vector_store %arg6[%c3, %c3_26], %44 {strides = array<i32>} : memref<22x22xf32, #tpu.memory_space<vmem>>, vector<1x16xf32>,
    %c0_27 = arith.constant 0 : index
    %c16 = arith.constant 16 : index
    %46 = vector.load %arg7[%c0_27, %c16] : memref<1x256xf32, #tpu.memory_space<vmem>>, vector<1x16xf32>
    %c4 = arith.constant 4 : index
    %c3_28 = arith.constant 3 : index
    %47 = vector.load %arg6[%c4, %c3_28] : memref<22x22xf32, #tpu.memory_space<vmem>>, vector<1x16xf32>
    tpu.vector_store %arg6[%c4, %c3_28], %46 {strides = array<i32>} : memref<22x22xf32, #tpu.memory_space<vmem>>, vector<1x16xf32>,
    %c0_29 = arith.constant 0 : index
    %c32 = arith.constant 32 : index
    %48 = vector.load %arg7[%c0_29, %c32] : memref<1x256xf32, #tpu.memory_space<vmem>>, vector<1x16xf32>
    %c5 = arith.constant 5 : index
    %c3_30 = arith.constant 3 : index
    %49 = vector.load %arg6[%c5, %c3_30] : memref<22x22xf32, #tpu.memory_space<vmem>>, vector<1x16xf32>
    tpu.vector_store %arg6[%c5, %c3_30], %48 {strides = array<i32>} : memref<22x22xf32, #tpu.memory_space<vmem>>, vector<1x16xf32>,
    %c0_31 = arith.constant 0 : index
    %c48 = arith.constant 48 : index
    %50 = vector.load %arg7[%c0_31, %c48] : memref<1x256xf32, #tpu.memory_space<vmem>>, vector<1x16xf32>
    %c6 = arith.constant 6 : index
    %c3_32 = arith.constant 3 : index
    %51 = vector.load %arg6[%c6, %c3_32] : memref<22x22xf32, #tpu.memory_space<vmem>>, vector<1x16xf32>
    tpu.vector_store %arg6[%c6, %c3_32], %50 {strides = array<i32>} : memref<22x22xf32, #tpu.memory_space<vmem>>, vector<1x16xf32>,
    %c0_33 = arith.constant 0 : index
    %c64 = arith.constant 64 : index
    %52 = vector.load %arg7[%c0_33, %c64] : memref<1x256xf32, #tpu.memory_space<vmem>>, vector<1x16xf32>
    %c7 = arith.constant 7 : index
    %c3_34 = arith.constant 3 : index
    %53 = vector.load %arg6[%c7, %c3_34] : memref<22x22xf32, #tpu.memory_space<vmem>>, vector<1x16xf32>
    tpu.vector_store %arg6[%c7, %c3_34], %52 {strides = array<i32>} : memref<22x22xf32, #tpu.memory_space<vmem>>, vector<1x16xf32>,
    %c0_35 = arith.constant 0 : index
    %c80 = arith.constant 80 : index
    %54 = vector.load %arg7[%c0_35, %c80] : memref<1x256xf32, #tpu.memory_space<vmem>>, vector<1x16xf32>
    %c8 = arith.constant 8 : index
    %c3_36 = arith.constant 3 : index
    %55 = vector.load %arg6[%c8, %c3_36] : memref<22x22xf32, #tpu.memory_space<vmem>>, vector<1x16xf32>
    tpu.vector_store %arg6[%c8, %c3_36], %54 {strides = array<i32>} : memref<22x22xf32, #tpu.memory_space<vmem>>, vector<1x16xf32>,
    %c0_37 = arith.constant 0 : index
    %c96 = arith.constant 96 : index
    %56 = vector.load %arg7[%c0_37, %c96] : memref<1x256xf32, #tpu.memory_space<vmem>>, vector<1x16xf32>
    %c9 = arith.constant 9 : index
    %c3_38 = arith.constant 3 : index
    %57 = vector.load %arg6[%c9, %c3_38] : memref<22x22xf32, #tpu.memory_space<vmem>>, vector<1x16xf32>
    tpu.vector_store %arg6[%c9, %c3_38], %56 {strides = array<i32>} : memref<22x22xf32, #tpu.memory_space<vmem>>, vector<1x16xf32>,
    %c0_39 = arith.constant 0 : index
    %c112 = arith.constant 112 : index
    %58 = vector.load %arg7[%c0_39, %c112] : memref<1x256xf32, #tpu.memory_space<vmem>>, vector<1x16xf32>
    %c10 = arith.constant 10 : index
    %c3_40 = arith.constant 3 : index
    %59 = vector.load %arg6[%c10, %c3_40] : memref<22x22xf32, #tpu.memory_space<vmem>>, vector<1x16xf32>
    tpu.vector_store %arg6[%c10, %c3_40], %58 {strides = array<i32>} : memref<22x22xf32, #tpu.memory_space<vmem>>, vector<1x16xf32>,
    %c0_41 = arith.constant 0 : index
    %c128 = arith.constant 128 : index
    %60 = vector.load %arg7[%c0_41, %c128] : memref<1x256xf32, #tpu.memory_space<vmem>>, vector<1x16xf32>
    %c11 = arith.constant 11 : index
    %c3_42 = arith.constant 3 : index
    %61 = vector.load %arg6[%c11, %c3_42] : memref<22x22xf32, #tpu.memory_space<vmem>>, vector<1x16xf32>
    tpu.vector_store %arg6[%c11, %c3_42], %60 {strides = array<i32>} : memref<22x22xf32, #tpu.memory_space<vmem>>, vector<1x16xf32>,
    %c0_43 = arith.constant 0 : index
    %c144 = arith.constant 144 : index
    %62 = vector.load %arg7[%c0_43, %c144] : memref<1x256xf32, #tpu.memory_space<vmem>>, vector<1x16xf32>
    %c12 = arith.constant 12 : index
    %c3_44 = arith.constant 3 : index
    %63 = vector.load %arg6[%c12, %c3_44] : memref<22x22xf32, #tpu.memory_space<vmem>>, vector<1x16xf32>
    tpu.vector_store %arg6[%c12, %c3_44], %62 {strides = array<i32>} : memref<22x22xf32, #tpu.memory_space<vmem>>, vector<1x16xf32>,
    %c0_45 = arith.constant 0 : index
    %c160 = arith.constant 160 : index
    %64 = vector.load %arg7[%c0_45, %c160] : memref<1x256xf32, #tpu.memory_space<vmem>>, vector<1x16xf32>
    %c13 = arith.constant 13 : index
    %c3_46 = arith.constant 3 : index
    %65 = vector.load %arg6[%c13, %c3_46] : memref<22x22xf32, #tpu.memory_space<vmem>>, vector<1x16xf32>
    tpu.vector_store %arg6[%c13, %c3_46], %64 {strides = array<i32>} : memref<22x22xf32, #tpu.memory_space<vmem>>, vector<1x16xf32>,
    %c0_47 = arith.constant 0 : index
    %c176 = arith.constant 176 : index
    %66 = vector.load %arg7[%c0_47, %c176] : memref<1x256xf32, #tpu.memory_space<vmem>>, vector<1x16xf32>
    %c14 = arith.constant 14 : index
    %c3_48 = arith.constant 3 : index
    %67 = vector.load %arg6[%c14, %c3_48] : memref<22x22xf32, #tpu.memory_space<vmem>>, vector<1x16xf32>
    tpu.vector_store %arg6[%c14, %c3_48], %66 {strides = array<i32>} : memref<22x22xf32, #tpu.memory_space<vmem>>, vector<1x16xf32>,
    %c0_49 = arith.constant 0 : index
    %c192 = arith.constant 192 : index
    %68 = vector.load %arg7[%c0_49, %c192] : memref<1x256xf32, #tpu.memory_space<vmem>>, vector<1x16xf32>
    %c15 = arith.constant 15 : index
    %c3_50 = arith.constant 3 : index
    %69 = vector.load %arg6[%c15, %c3_50] : memref<22x22xf32, #tpu.memory_space<vmem>>, vector<1x16xf32>
    tpu.vector_store %arg6[%c15, %c3_50], %68 {strides = array<i32>} : memref<22x22xf32, #tpu.memory_space<vmem>>, vector<1x16xf32>,
    %c0_51 = arith.constant 0 : index
    %c208 = arith.constant 208 : index
    %70 = vector.load %arg7[%c0_51, %c208] : memref<1x256xf32, #tpu.memory_space<vmem>>, vector<1x16xf32>
    %c16_52 = arith.constant 16 : index
    %c3_53 = arith.constant 3 : index
    %71 = vector.load %arg6[%c16_52, %c3_53] : memref<22x22xf32, #tpu.memory_space<vmem>>, vector<1x16xf32>
    tpu.vector_store %arg6[%c16_52, %c3_53], %70 {strides = array<i32>} : memref<22x22xf32, #tpu.memory_space<vmem>>, vector<1x16xf32>,
    %c0_54 = arith.constant 0 : index
    %c224 = arith.constant 224 : index
    %72 = vector.load %arg7[%c0_54, %c224] : memref<1x256xf32, #tpu.memory_space<vmem>>, vector<1x16xf32>
    %c17 = arith.constant 17 : index
    %c3_55 = arith.constant 3 : index
    %73 = vector.load %arg6[%c17, %c3_55] : memref<22x22xf32, #tpu.memory_space<vmem>>, vector<1x16xf32>
    tpu.vector_store %arg6[%c17, %c3_55], %72 {strides = array<i32>} : memref<22x22xf32, #tpu.memory_space<vmem>>, vector<1x16xf32>,
    %c0_56 = arith.constant 0 : index
    %c240 = arith.constant 240 : index
    %74 = vector.load %arg7[%c0_56, %c240] : memref<1x256xf32, #tpu.memory_space<vmem>>, vector<1x16xf32>
    %c18 = arith.constant 18 : index
    %c3_57 = arith.constant 3 : index
    %75 = vector.load %arg6[%c18, %c3_57] : memref<22x22xf32, #tpu.memory_space<vmem>>, vector<1x16xf32>
    tpu.vector_store %arg6[%c18, %c3_57], %74 {strides = array<i32>} : memref<22x22xf32, #tpu.memory_space<vmem>>, vector<1x16xf32>,
    %cst_58 = arith.constant 0.000000e+00 : f32
    %76 = vector.broadcast %cst_58 : f32 to vector<16x16xf32>
    %c0_59 = arith.constant 0 : index
    %c0_60 = arith.constant 0 : index
    %77 = memref.load %arg4[%c0_59, %c0_60] : memref<7x7xf32, #tpu.memory_space<smem>>
    %c0_61 = arith.constant 0 : index
    %c0_62 = arith.constant 0 : index
    %78 = vector.load %arg6[%c0_61, %c0_62] : memref<22x22xf32, #tpu.memory_space<vmem>>, vector<16x16xf32>
    %79 = vector.broadcast %77 : f32 to vector<16x16xf32>
    %80 = arith.mulf %79, %78 : vector<16x16xf32>
    %81 = arith.addf %76, %80 : vector<16x16xf32>
    %c0_63 = arith.constant 0 : index
    %c1 = arith.constant 1 : index
    %82 = memref.load %arg4[%c0_63, %c1] : memref<7x7xf32, #tpu.memory_space<smem>>
    %c0_64 = arith.constant 0 : index
    %c1_65 = arith.constant 1 : index
    %83 = vector.load %arg6[%c0_64, %c1_65] : memref<22x22xf32, #tpu.memory_space<vmem>>, vector<16x16xf32>
    %84 = vector.broadcast %82 : f32 to vector<16x16xf32>
    %85 = arith.mulf %84, %83 : vector<16x16xf32>
    %86 = arith.addf %81, %85 : vector<16x16xf32>
    %c0_66 = arith.constant 0 : index
    %c2 = arith.constant 2 : index
    %87 = memref.load %arg4[%c0_66, %c2] : memref<7x7xf32, #tpu.memory_space<smem>>
    %c0_67 = arith.constant 0 : index
    %c2_68 = arith.constant 2 : index
    %88 = vector.load %arg6[%c0_67, %c2_68] : memref<22x22xf32, #tpu.memory_space<vmem>>, vector<16x16xf32>
    %89 = vector.broadcast %87 : f32 to vector<16x16xf32>
    %90 = arith.mulf %89, %88 : vector<16x16xf32>
    %91 = arith.addf %86, %90 : vector<16x16xf32>
    %c0_69 = arith.constant 0 : index
    %c3_70 = arith.constant 3 : index
    %92 = memref.load %arg4[%c0_69, %c3_70] : memref<7x7xf32, #tpu.memory_space<smem>>
    %c0_71 = arith.constant 0 : index
    %c3_72 = arith.constant 3 : index
    %93 = vector.load %arg6[%c0_71, %c3_72] : memref<22x22xf32, #tpu.memory_space<vmem>>, vector<16x16xf32>
    %94 = vector.broadcast %92 : f32 to vector<16x16xf32>
    %95 = arith.mulf %94, %93 : vector<16x16xf32>
    %96 = arith.addf %91, %95 : vector<16x16xf32>
    %c0_73 = arith.constant 0 : index
    %c4_74 = arith.constant 4 : index
    %97 = memref.load %arg4[%c0_73, %c4_74] : memref<7x7xf32, #tpu.memory_space<smem>>
    %c0_75 = arith.constant 0 : index
    %c4_76 = arith.constant 4 : index
    %98 = vector.load %arg6[%c0_75, %c4_76] : memref<22x22xf32, #tpu.memory_space<vmem>>, vector<16x16xf32>
    %99 = vector.broadcast %97 : f32 to vector<16x16xf32>
    %100 = arith.mulf %99, %98 : vector<16x16xf32>
    %101 = arith.addf %96, %100 : vector<16x16xf32>
    %c0_77 = arith.constant 0 : index
    %c5_78 = arith.constant 5 : index
    %102 = memref.load %arg4[%c0_77, %c5_78] : memref<7x7xf32, #tpu.memory_space<smem>>
    %c0_79 = arith.constant 0 : index
    %c5_80 = arith.constant 5 : index
    %103 = vector.load %arg6[%c0_79, %c5_80] : memref<22x22xf32, #tpu.memory_space<vmem>>, vector<16x16xf32>
    %104 = vector.broadcast %102 : f32 to vector<16x16xf32>
    %105 = arith.mulf %104, %103 : vector<16x16xf32>
    %106 = arith.addf %101, %105 : vector<16x16xf32>
    %c0_81 = arith.constant 0 : index
    %c6_82 = arith.constant 6 : index
    %107 = memref.load %arg4[%c0_81, %c6_82] : memref<7x7xf32, #tpu.memory_space<smem>>
    %c0_83 = arith.constant 0 : index
    %c6_84 = arith.constant 6 : index
    %108 = vector.load %arg6[%c0_83, %c6_84] : memref<22x22xf32, #tpu.memory_space<vmem>>, vector<16x16xf32>
    %109 = vector.broadcast %107 : f32 to vector<16x16xf32>
    %110 = arith.mulf %109, %108 : vector<16x16xf32>
    %111 = arith.addf %106, %110 : vector<16x16xf32>
    %c1_85 = arith.constant 1 : index
    %c0_86 = arith.constant 0 : index
    %112 = memref.load %arg4[%c1_85, %c0_86] : memref<7x7xf32, #tpu.memory_space<smem>>
    %c1_87 = arith.constant 1 : index
    %c0_88 = arith.constant 0 : index
    %113 = vector.load %arg6[%c1_87, %c0_88] : memref<22x22xf32, #tpu.memory_space<vmem>>, vector<16x16xf32>
    %114 = vector.broadcast %112 : f32 to vector<16x16xf32>
    %115 = arith.mulf %114, %113 : vector<16x16xf32>
    %116 = arith.addf %111, %115 : vector<16x16xf32>
    %c1_89 = arith.constant 1 : index
    %c1_90 = arith.constant 1 : index
    %117 = memref.load %arg4[%c1_89, %c1_90] : memref<7x7xf32, #tpu.memory_space<smem>>
    %c1_91 = arith.constant 1 : index
    %c1_92 = arith.constant 1 : index
    %118 = vector.load %arg6[%c1_91, %c1_92] : memref<22x22xf32, #tpu.memory_space<vmem>>, vector<16x16xf32>
    %119 = vector.broadcast %117 : f32 to vector<16x16xf32>
    %120 = arith.mulf %119, %118 : vector<16x16xf32>
    %121 = arith.addf %116, %120 : vector<16x16xf32>
    %c1_93 = arith.constant 1 : index
    %c2_94 = arith.constant 2 : index
    %122 = memref.load %arg4[%c1_93, %c2_94] : memref<7x7xf32, #tpu.memory_space<smem>>
    %c1_95 = arith.constant 1 : index
    %c2_96 = arith.constant 2 : index
    %123 = vector.load %arg6[%c1_95, %c2_96] : memref<22x22xf32, #tpu.memory_space<vmem>>, vector<16x16xf32>
    %124 = vector.broadcast %122 : f32 to vector<16x16xf32>
    %125 = arith.mulf %124, %123 : vector<16x16xf32>
    %126 = arith.addf %121, %125 : vector<16x16xf32>
    %c1_97 = arith.constant 1 : index
    %c3_98 = arith.constant 3 : index
    %127 = memref.load %arg4[%c1_97, %c3_98] : memref<7x7xf32, #tpu.memory_space<smem>>
    %c1_99 = arith.constant 1 : index
    %c3_100 = arith.constant 3 : index
    %128 = vector.load %arg6[%c1_99, %c3_100] : memref<22x22xf32, #tpu.memory_space<vmem>>, vector<16x16xf32>
    %129 = vector.broadcast %127 : f32 to vector<16x16xf32>
    %130 = arith.mulf %129, %128 : vector<16x16xf32>
    %131 = arith.addf %126, %130 : vector<16x16xf32>
    %c1_101 = arith.constant 1 : index
    %c4_102 = arith.constant 4 : index
    %132 = memref.load %arg4[%c1_101, %c4_102] : memref<7x7xf32, #tpu.memory_space<smem>>
    %c1_103 = arith.constant 1 : index
    %c4_104 = arith.constant 4 : index
    %133 = vector.load %arg6[%c1_103, %c4_104] : memref<22x22xf32, #tpu.memory_space<vmem>>, vector<16x16xf32>
    %134 = vector.broadcast %132 : f32 to vector<16x16xf32>
    %135 = arith.mulf %134, %133 : vector<16x16xf32>
    %136 = arith.addf %131, %135 : vector<16x16xf32>
    %c1_105 = arith.constant 1 : index
    %c5_106 = arith.constant 5 : index
    %137 = memref.load %arg4[%c1_105, %c5_106] : memref<7x7xf32, #tpu.memory_space<smem>>
    %c1_107 = arith.constant 1 : index
    %c5_108 = arith.constant 5 : index
    %138 = vector.load %arg6[%c1_107, %c5_108] : memref<22x22xf32, #tpu.memory_space<vmem>>, vector<16x16xf32>
    %139 = vector.broadcast %137 : f32 to vector<16x16xf32>
    %140 = arith.mulf %139, %138 : vector<16x16xf32>
    %141 = arith.addf %136, %140 : vector<16x16xf32>
    %c1_109 = arith.constant 1 : index
    %c6_110 = arith.constant 6 : index
    %142 = memref.load %arg4[%c1_109, %c6_110] : memref<7x7xf32, #tpu.memory_space<smem>>
    %c1_111 = arith.constant 1 : index
    %c6_112 = arith.constant 6 : index
    %143 = vector.load %arg6[%c1_111, %c6_112] : memref<22x22xf32, #tpu.memory_space<vmem>>, vector<16x16xf32>
    %144 = vector.broadcast %142 : f32 to vector<16x16xf32>
    %145 = arith.mulf %144, %143 : vector<16x16xf32>
    %146 = arith.addf %141, %145 : vector<16x16xf32>
    %c2_113 = arith.constant 2 : index
    %c0_114 = arith.constant 0 : index
    %147 = memref.load %arg4[%c2_113, %c0_114] : memref<7x7xf32, #tpu.memory_space<smem>>
    %c2_115 = arith.constant 2 : index
    %c0_116 = arith.constant 0 : index
    %148 = vector.load %arg6[%c2_115, %c0_116] : memref<22x22xf32, #tpu.memory_space<vmem>>, vector<16x16xf32>
    %149 = vector.broadcast %147 : f32 to vector<16x16xf32>
    %150 = arith.mulf %149, %148 : vector<16x16xf32>
    %151 = arith.addf %146, %150 : vector<16x16xf32>
    %c2_117 = arith.constant 2 : index
    %c1_118 = arith.constant 1 : index
    %152 = memref.load %arg4[%c2_117, %c1_118] : memref<7x7xf32, #tpu.memory_space<smem>>
    %c2_119 = arith.constant 2 : index
    %c1_120 = arith.constant 1 : index
    %153 = vector.load %arg6[%c2_119, %c1_120] : memref<22x22xf32, #tpu.memory_space<vmem>>, vector<16x16xf32>
    %154 = vector.broadcast %152 : f32 to vector<16x16xf32>
    %155 = arith.mulf %154, %153 : vector<16x16xf32>
    %156 = arith.addf %151, %155 : vector<16x16xf32>
    %c2_121 = arith.constant 2 : index
    %c2_122 = arith.constant 2 : index
    %157 = memref.load %arg4[%c2_121, %c2_122] : memref<7x7xf32, #tpu.memory_space<smem>>
    %c2_123 = arith.constant 2 : index
    %c2_124 = arith.constant 2 : index
    %158 = vector.load %arg6[%c2_123, %c2_124] : memref<22x22xf32, #tpu.memory_space<vmem>>, vector<16x16xf32>
    %159 = vector.broadcast %157 : f32 to vector<16x16xf32>
    %160 = arith.mulf %159, %158 : vector<16x16xf32>
    %161 = arith.addf %156, %160 : vector<16x16xf32>
    %c2_125 = arith.constant 2 : index
    %c3_126 = arith.constant 3 : index
    %162 = memref.load %arg4[%c2_125, %c3_126] : memref<7x7xf32, #tpu.memory_space<smem>>
    %c2_127 = arith.constant 2 : index
    %c3_128 = arith.constant 3 : index
    %163 = vector.load %arg6[%c2_127, %c3_128] : memref<22x22xf32, #tpu.memory_space<vmem>>, vector<16x16xf32>
    %164 = vector.broadcast %162 : f32 to vector<16x16xf32>
    %165 = arith.mulf %164, %163 : vector<16x16xf32>
    %166 = arith.addf %161, %165 : vector<16x16xf32>
    %c2_129 = arith.constant 2 : index
    %c4_130 = arith.constant 4 : index
    %167 = memref.load %arg4[%c2_129, %c4_130] : memref<7x7xf32, #tpu.memory_space<smem>>
    %c2_131 = arith.constant 2 : index
    %c4_132 = arith.constant 4 : index
    %168 = vector.load %arg6[%c2_131, %c4_132] : memref<22x22xf32, #tpu.memory_space<vmem>>, vector<16x16xf32>
    %169 = vector.broadcast %167 : f32 to vector<16x16xf32>
    %170 = arith.mulf %169, %168 : vector<16x16xf32>
    %171 = arith.addf %166, %170 : vector<16x16xf32>
    %c2_133 = arith.constant 2 : index
    %c5_134 = arith.constant 5 : index
    %172 = memref.load %arg4[%c2_133, %c5_134] : memref<7x7xf32, #tpu.memory_space<smem>>
    %c2_135 = arith.constant 2 : index
    %c5_136 = arith.constant 5 : index
    %173 = vector.load %arg6[%c2_135, %c5_136] : memref<22x22xf32, #tpu.memory_space<vmem>>, vector<16x16xf32>
    %174 = vector.broadcast %172 : f32 to vector<16x16xf32>
    %175 = arith.mulf %174, %173 : vector<16x16xf32>
    %176 = arith.addf %171, %175 : vector<16x16xf32>
    %c2_137 = arith.constant 2 : index
    %c6_138 = arith.constant 6 : index
    %177 = memref.load %arg4[%c2_137, %c6_138] : memref<7x7xf32, #tpu.memory_space<smem>>
    %c2_139 = arith.constant 2 : index
    %c6_140 = arith.constant 6 : index
    %178 = vector.load %arg6[%c2_139, %c6_140] : memref<22x22xf32, #tpu.memory_space<vmem>>, vector<16x16xf32>
    %179 = vector.broadcast %177 : f32 to vector<16x16xf32>
    %180 = arith.mulf %179, %178 : vector<16x16xf32>
    %181 = arith.addf %176, %180 : vector<16x16xf32>
    %c3_141 = arith.constant 3 : index
    %c0_142 = arith.constant 0 : index
    %182 = memref.load %arg4[%c3_141, %c0_142] : memref<7x7xf32, #tpu.memory_space<smem>>
    %c3_143 = arith.constant 3 : index
    %c0_144 = arith.constant 0 : index
    %183 = vector.load %arg6[%c3_143, %c0_144] : memref<22x22xf32, #tpu.memory_space<vmem>>, vector<16x16xf32>
    %184 = vector.broadcast %182 : f32 to vector<16x16xf32>
    %185 = arith.mulf %184, %183 : vector<16x16xf32>
    %186 = arith.addf %181, %185 : vector<16x16xf32>
    %c3_145 = arith.constant 3 : index
    %c1_146 = arith.constant 1 : index
    %187 = memref.load %arg4[%c3_145, %c1_146] : memref<7x7xf32, #tpu.memory_space<smem>>
    %c3_147 = arith.constant 3 : index
    %c1_148 = arith.constant 1 : index
    %188 = vector.load %arg6[%c3_147, %c1_148] : memref<22x22xf32, #tpu.memory_space<vmem>>, vector<16x16xf32>
    %189 = vector.broadcast %187 : f32 to vector<16x16xf32>
    %190 = arith.mulf %189, %188 : vector<16x16xf32>
    %191 = arith.addf %186, %190 : vector<16x16xf32>
    %c3_149 = arith.constant 3 : index
    %c2_150 = arith.constant 2 : index
    %192 = memref.load %arg4[%c3_149, %c2_150] : memref<7x7xf32, #tpu.memory_space<smem>>
    %c3_151 = arith.constant 3 : index
    %c2_152 = arith.constant 2 : index
    %193 = vector.load %arg6[%c3_151, %c2_152] : memref<22x22xf32, #tpu.memory_space<vmem>>, vector<16x16xf32>
    %194 = vector.broadcast %192 : f32 to vector<16x16xf32>
    %195 = arith.mulf %194, %193 : vector<16x16xf32>
    %196 = arith.addf %191, %195 : vector<16x16xf32>
    %c3_153 = arith.constant 3 : index
    %c3_154 = arith.constant 3 : index
    %197 = memref.load %arg4[%c3_153, %c3_154] : memref<7x7xf32, #tpu.memory_space<smem>>
    %c3_155 = arith.constant 3 : index
    %c3_156 = arith.constant 3 : index
    %198 = vector.load %arg6[%c3_155, %c3_156] : memref<22x22xf32, #tpu.memory_space<vmem>>, vector<16x16xf32>
    %199 = vector.broadcast %197 : f32 to vector<16x16xf32>
    %200 = arith.mulf %199, %198 : vector<16x16xf32>
    %201 = arith.addf %196, %200 : vector<16x16xf32>
    %c3_157 = arith.constant 3 : index
    %c4_158 = arith.constant 4 : index
    %202 = memref.load %arg4[%c3_157, %c4_158] : memref<7x7xf32, #tpu.memory_space<smem>>
    %c3_159 = arith.constant 3 : index
    %c4_160 = arith.constant 4 : index
    %203 = vector.load %arg6[%c3_159, %c4_160] : memref<22x22xf32, #tpu.memory_space<vmem>>, vector<16x16xf32>
    %204 = vector.broadcast %202 : f32 to vector<16x16xf32>
    %205 = arith.mulf %204, %203 : vector<16x16xf32>
    %206 = arith.addf %201, %205 : vector<16x16xf32>
    %c3_161 = arith.constant 3 : index
    %c5_162 = arith.constant 5 : index
    %207 = memref.load %arg4[%c3_161, %c5_162] : memref<7x7xf32, #tpu.memory_space<smem>>
    %c3_163 = arith.constant 3 : index
    %c5_164 = arith.constant 5 : index
    %208 = vector.load %arg6[%c3_163, %c5_164] : memref<22x22xf32, #tpu.memory_space<vmem>>, vector<16x16xf32>
    %209 = vector.broadcast %207 : f32 to vector<16x16xf32>
    %210 = arith.mulf %209, %208 : vector<16x16xf32>
    %211 = arith.addf %206, %210 : vector<16x16xf32>
    %c3_165 = arith.constant 3 : index
    %c6_166 = arith.constant 6 : index
    %212 = memref.load %arg4[%c3_165, %c6_166] : memref<7x7xf32, #tpu.memory_space<smem>>
    %c3_167 = arith.constant 3 : index
    %c6_168 = arith.constant 6 : index
    %213 = vector.load %arg6[%c3_167, %c6_168] : memref<22x22xf32, #tpu.memory_space<vmem>>, vector<16x16xf32>
    %214 = vector.broadcast %212 : f32 to vector<16x16xf32>
    %215 = arith.mulf %214, %213 : vector<16x16xf32>
    %216 = arith.addf %211, %215 : vector<16x16xf32>
    %c4_169 = arith.constant 4 : index
    %c0_170 = arith.constant 0 : index
    %217 = memref.load %arg4[%c4_169, %c0_170] : memref<7x7xf32, #tpu.memory_space<smem>>
    %c4_171 = arith.constant 4 : index
    %c0_172 = arith.constant 0 : index
    %218 = vector.load %arg6[%c4_171, %c0_172] : memref<22x22xf32, #tpu.memory_space<vmem>>, vector<16x16xf32>
    %219 = vector.broadcast %217 : f32 to vector<16x16xf32>
    %220 = arith.mulf %219, %218 : vector<16x16xf32>
    %221 = arith.addf %216, %220 : vector<16x16xf32>
    %c4_173 = arith.constant 4 : index
    %c1_174 = arith.constant 1 : index
    %222 = memref.load %arg4[%c4_173, %c1_174] : memref<7x7xf32, #tpu.memory_space<smem>>
    %c4_175 = arith.constant 4 : index
    %c1_176 = arith.constant 1 : index
    %223 = vector.load %arg6[%c4_175, %c1_176] : memref<22x22xf32, #tpu.memory_space<vmem>>, vector<16x16xf32>
    %224 = vector.broadcast %222 : f32 to vector<16x16xf32>
    %225 = arith.mulf %224, %223 : vector<16x16xf32>
    %226 = arith.addf %221, %225 : vector<16x16xf32>
    %c4_177 = arith.constant 4 : index
    %c2_178 = arith.constant 2 : index
    %227 = memref.load %arg4[%c4_177, %c2_178] : memref<7x7xf32, #tpu.memory_space<smem>>
    %c4_179 = arith.constant 4 : index
    %c2_180 = arith.constant 2 : index
    %228 = vector.load %arg6[%c4_179, %c2_180] : memref<22x22xf32, #tpu.memory_space<vmem>>, vector<16x16xf32>
    %229 = vector.broadcast %227 : f32 to vector<16x16xf32>
    %230 = arith.mulf %229, %228 : vector<16x16xf32>
    %231 = arith.addf %226, %230 : vector<16x16xf32>
    %c4_181 = arith.constant 4 : index
    %c3_182 = arith.constant 3 : index
    %232 = memref.load %arg4[%c4_181, %c3_182] : memref<7x7xf32, #tpu.memory_space<smem>>
    %c4_183 = arith.constant 4 : index
    %c3_184 = arith.constant 3 : index
    %233 = vector.load %arg6[%c4_183, %c3_184] : memref<22x22xf32, #tpu.memory_space<vmem>>, vector<16x16xf32>
    %234 = vector.broadcast %232 : f32 to vector<16x16xf32>
    %235 = arith.mulf %234, %233 : vector<16x16xf32>
    %236 = arith.addf %231, %235 : vector<16x16xf32>
    %c4_185 = arith.constant 4 : index
    %c4_186 = arith.constant 4 : index
    %237 = memref.load %arg4[%c4_185, %c4_186] : memref<7x7xf32, #tpu.memory_space<smem>>
    %c4_187 = arith.constant 4 : index
    %c4_188 = arith.constant 4 : index
    %238 = vector.load %arg6[%c4_187, %c4_188] : memref<22x22xf32, #tpu.memory_space<vmem>>, vector<16x16xf32>
    %239 = vector.broadcast %237 : f32 to vector<16x16xf32>
    %240 = arith.mulf %239, %238 : vector<16x16xf32>
    %241 = arith.addf %236, %240 : vector<16x16xf32>
    %c4_189 = arith.constant 4 : index
    %c5_190 = arith.constant 5 : index
    %242 = memref.load %arg4[%c4_189, %c5_190] : memref<7x7xf32, #tpu.memory_space<smem>>
    %c4_191 = arith.constant 4 : index
    %c5_192 = arith.constant 5 : index
    %243 = vector.load %arg6[%c4_191, %c5_192] : memref<22x22xf32, #tpu.memory_space<vmem>>, vector<16x16xf32>
    %244 = vector.broadcast %242 : f32 to vector<16x16xf32>
    %245 = arith.mulf %244, %243 : vector<16x16xf32>
    %246 = arith.addf %241, %245 : vector<16x16xf32>
    %c4_193 = arith.constant 4 : index
    %c6_194 = arith.constant 6 : index
    %247 = memref.load %arg4[%c4_193, %c6_194] : memref<7x7xf32, #tpu.memory_space<smem>>
    %c4_195 = arith.constant 4 : index
    %c6_196 = arith.constant 6 : index
    %248 = vector.load %arg6[%c4_195, %c6_196] : memref<22x22xf32, #tpu.memory_space<vmem>>, vector<16x16xf32>
    %249 = vector.broadcast %247 : f32 to vector<16x16xf32>
    %250 = arith.mulf %249, %248 : vector<16x16xf32>
    %251 = arith.addf %246, %250 : vector<16x16xf32>
    %c5_197 = arith.constant 5 : index
    %c0_198 = arith.constant 0 : index
    %252 = memref.load %arg4[%c5_197, %c0_198] : memref<7x7xf32, #tpu.memory_space<smem>>
    %c5_199 = arith.constant 5 : index
    %c0_200 = arith.constant 0 : index
    %253 = vector.load %arg6[%c5_199, %c0_200] : memref<22x22xf32, #tpu.memory_space<vmem>>, vector<16x16xf32>
    %254 = vector.broadcast %252 : f32 to vector<16x16xf32>
    %255 = arith.mulf %254, %253 : vector<16x16xf32>
    %256 = arith.addf %251, %255 : vector<16x16xf32>
    %c5_201 = arith.constant 5 : index
    %c1_202 = arith.constant 1 : index
    %257 = memref.load %arg4[%c5_201, %c1_202] : memref<7x7xf32, #tpu.memory_space<smem>>
    %c5_203 = arith.constant 5 : index
    %c1_204 = arith.constant 1 : index
    %258 = vector.load %arg6[%c5_203, %c1_204] : memref<22x22xf32, #tpu.memory_space<vmem>>, vector<16x16xf32>
    %259 = vector.broadcast %257 : f32 to vector<16x16xf32>
    %260 = arith.mulf %259, %258 : vector<16x16xf32>
    %261 = arith.addf %256, %260 : vector<16x16xf32>
    %c5_205 = arith.constant 5 : index
    %c2_206 = arith.constant 2 : index
    %262 = memref.load %arg4[%c5_205, %c2_206] : memref<7x7xf32, #tpu.memory_space<smem>>
    %c5_207 = arith.constant 5 : index
    %c2_208 = arith.constant 2 : index
    %263 = vector.load %arg6[%c5_207, %c2_208] : memref<22x22xf32, #tpu.memory_space<vmem>>, vector<16x16xf32>
    %264 = vector.broadcast %262 : f32 to vector<16x16xf32>
    %265 = arith.mulf %264, %263 : vector<16x16xf32>
    %266 = arith.addf %261, %265 : vector<16x16xf32>
    %c5_209 = arith.constant 5 : index
    %c3_210 = arith.constant 3 : index
    %267 = memref.load %arg4[%c5_209, %c3_210] : memref<7x7xf32, #tpu.memory_space<smem>>
    %c5_211 = arith.constant 5 : index
    %c3_212 = arith.constant 3 : index
    %268 = vector.load %arg6[%c5_211, %c3_212] : memref<22x22xf32, #tpu.memory_space<vmem>>, vector<16x16xf32>
    %269 = vector.broadcast %267 : f32 to vector<16x16xf32>
    %270 = arith.mulf %269, %268 : vector<16x16xf32>
    %271 = arith.addf %266, %270 : vector<16x16xf32>
    %c5_213 = arith.constant 5 : index
    %c4_214 = arith.constant 4 : index
    %272 = memref.load %arg4[%c5_213, %c4_214] : memref<7x7xf32, #tpu.memory_space<smem>>
    %c5_215 = arith.constant 5 : index
    %c4_216 = arith.constant 4 : index
    %273 = vector.load %arg6[%c5_215, %c4_216] : memref<22x22xf32, #tpu.memory_space<vmem>>, vector<16x16xf32>
    %274 = vector.broadcast %272 : f32 to vector<16x16xf32>
    %275 = arith.mulf %274, %273 : vector<16x16xf32>
    %276 = arith.addf %271, %275 : vector<16x16xf32>
    %c5_217 = arith.constant 5 : index
    %c5_218 = arith.constant 5 : index
    %277 = memref.load %arg4[%c5_217, %c5_218] : memref<7x7xf32, #tpu.memory_space<smem>>
    %c5_219 = arith.constant 5 : index
    %c5_220 = arith.constant 5 : index
    %278 = vector.load %arg6[%c5_219, %c5_220] : memref<22x22xf32, #tpu.memory_space<vmem>>, vector<16x16xf32>
    %279 = vector.broadcast %277 : f32 to vector<16x16xf32>
    %280 = arith.mulf %279, %278 : vector<16x16xf32>
    %281 = arith.addf %276, %280 : vector<16x16xf32>
    %c5_221 = arith.constant 5 : index
    %c6_222 = arith.constant 6 : index
    %282 = memref.load %arg4[%c5_221, %c6_222] : memref<7x7xf32, #tpu.memory_space<smem>>
    %c5_223 = arith.constant 5 : index
    %c6_224 = arith.constant 6 : index
    %283 = vector.load %arg6[%c5_223, %c6_224] : memref<22x22xf32, #tpu.memory_space<vmem>>, vector<16x16xf32>
    %284 = vector.broadcast %282 : f32 to vector<16x16xf32>
    %285 = arith.mulf %284, %283 : vector<16x16xf32>
    %286 = arith.addf %281, %285 : vector<16x16xf32>
    %c6_225 = arith.constant 6 : index
    %c0_226 = arith.constant 0 : index
    %287 = memref.load %arg4[%c6_225, %c0_226] : memref<7x7xf32, #tpu.memory_space<smem>>
    %c6_227 = arith.constant 6 : index
    %c0_228 = arith.constant 0 : index
    %288 = vector.load %arg6[%c6_227, %c0_228] : memref<22x22xf32, #tpu.memory_space<vmem>>, vector<16x16xf32>
    %289 = vector.broadcast %287 : f32 to vector<16x16xf32>
    %290 = arith.mulf %289, %288 : vector<16x16xf32>
    %291 = arith.addf %286, %290 : vector<16x16xf32>
    %c6_229 = arith.constant 6 : index
    %c1_230 = arith.constant 1 : index
    %292 = memref.load %arg4[%c6_229, %c1_230] : memref<7x7xf32, #tpu.memory_space<smem>>
    %c6_231 = arith.constant 6 : index
    %c1_232 = arith.constant 1 : index
    %293 = vector.load %arg6[%c6_231, %c1_232] : memref<22x22xf32, #tpu.memory_space<vmem>>, vector<16x16xf32>
    %294 = vector.broadcast %292 : f32 to vector<16x16xf32>
    %295 = arith.mulf %294, %293 : vector<16x16xf32>
    %296 = arith.addf %291, %295 : vector<16x16xf32>
    %c6_233 = arith.constant 6 : index
    %c2_234 = arith.constant 2 : index
    %297 = memref.load %arg4[%c6_233, %c2_234] : memref<7x7xf32, #tpu.memory_space<smem>>
    %c6_235 = arith.constant 6 : index
    %c2_236 = arith.constant 2 : index
    %298 = vector.load %arg6[%c6_235, %c2_236] : memref<22x22xf32, #tpu.memory_space<vmem>>, vector<16x16xf32>
    %299 = vector.broadcast %297 : f32 to vector<16x16xf32>
    %300 = arith.mulf %299, %298 : vector<16x16xf32>
    %301 = arith.addf %296, %300 : vector<16x16xf32>
    %c6_237 = arith.constant 6 : index
    %c3_238 = arith.constant 3 : index
    %302 = memref.load %arg4[%c6_237, %c3_238] : memref<7x7xf32, #tpu.memory_space<smem>>
    %c6_239 = arith.constant 6 : index
    %c3_240 = arith.constant 3 : index
    %303 = vector.load %arg6[%c6_239, %c3_240] : memref<22x22xf32, #tpu.memory_space<vmem>>, vector<16x16xf32>
    %304 = vector.broadcast %302 : f32 to vector<16x16xf32>
    %305 = arith.mulf %304, %303 : vector<16x16xf32>
    %306 = arith.addf %301, %305 : vector<16x16xf32>
    %c6_241 = arith.constant 6 : index
    %c4_242 = arith.constant 4 : index
    %307 = memref.load %arg4[%c6_241, %c4_242] : memref<7x7xf32, #tpu.memory_space<smem>>
    %c6_243 = arith.constant 6 : index
    %c4_244 = arith.constant 4 : index
    %308 = vector.load %arg6[%c6_243, %c4_244] : memref<22x22xf32, #tpu.memory_space<vmem>>, vector<16x16xf32>
    %309 = vector.broadcast %307 : f32 to vector<16x16xf32>
    %310 = arith.mulf %309, %308 : vector<16x16xf32>
    %311 = arith.addf %306, %310 : vector<16x16xf32>
    %c6_245 = arith.constant 6 : index
    %c5_246 = arith.constant 5 : index
    %312 = memref.load %arg4[%c6_245, %c5_246] : memref<7x7xf32, #tpu.memory_space<smem>>
    %c6_247 = arith.constant 6 : index
    %c5_248 = arith.constant 5 : index
    %313 = vector.load %arg6[%c6_247, %c5_248] : memref<22x22xf32, #tpu.memory_space<vmem>>, vector<16x16xf32>
    %314 = vector.broadcast %312 : f32 to vector<16x16xf32>
    %315 = arith.mulf %314, %313 : vector<16x16xf32>
    %316 = arith.addf %311, %315 : vector<16x16xf32>
    %c6_249 = arith.constant 6 : index
    %c6_250 = arith.constant 6 : index
    %317 = memref.load %arg4[%c6_249, %c6_250] : memref<7x7xf32, #tpu.memory_space<smem>>
    %c6_251 = arith.constant 6 : index
    %c6_252 = arith.constant 6 : index
    %318 = vector.load %arg6[%c6_251, %c6_252] : memref<22x22xf32, #tpu.memory_space<vmem>>, vector<16x16xf32>
    %319 = vector.broadcast %317 : f32 to vector<16x16xf32>
    %320 = arith.mulf %319, %318 : vector<16x16xf32>
    %321 = arith.addf %316, %320 : vector<16x16xf32>
    %cst_253 = arith.constant 0.000000e+00 : f32
    %322 = vector.broadcast %cst_253 : f32 to vector<16x16xf32>
    %323 = arith.subf %322, %321 : vector<16x16xf32>
    %324 = math.exp %323 : vector<16x16xf32>
    %cst_254 = arith.constant 1.000000e+00 : f32
    %325 = vector.broadcast %cst_254 : f32 to vector<16x16xf32>
    %326 = arith.addf %325, %324 : vector<16x16xf32>
    %cst_255 = arith.constant 1.000000e+00 : f32
    %327 = vector.broadcast %cst_255 : f32 to vector<16x16xf32>
    %328 = arith.divf %327, %326 : vector<16x16xf32>
    %c0_256 = arith.constant 0 : index
    %c0_257 = arith.constant 0 : index
    %329 = vector.load %arg8[%c0_256, %c0_257] : memref<16x16xf32, #tpu.memory_space<vmem>>, vector<16x16xf32>
    tpu.vector_store %arg8[%c0_256, %c0_257], %328 {strides = array<i32>} : memref<16x16xf32, #tpu.memory_space<vmem>>, vector<16x16xf32>,
    %c0_258 = arith.constant 0 : index
    %c0_259 = arith.constant 0 : index
    %330 = vector.load %arg8[%c0_258, %c0_259] : memref<16x16xf32, #tpu.memory_space<vmem>>, vector<1x16xf32>
    %c0_260 = arith.constant 0 : index
    %c0_261 = arith.constant 0 : index
    %331 = vector.load %arg7[%c0_260, %c0_261] : memref<1x256xf32, #tpu.memory_space<vmem>>, vector<1x16xf32>
    tpu.vector_store %arg7[%c0_260, %c0_261], %330 {strides = array<i32>} : memref<1x256xf32, #tpu.memory_space<vmem>>, vector<1x16xf32>,
    %c1_262 = arith.constant 1 : index
    %c0_263 = arith.constant 0 : index
    %332 = vector.load %arg8[%c1_262, %c0_263] : memref<16x16xf32, #tpu.memory_space<vmem>>, vector<1x16xf32>
    %c0_264 = arith.constant 0 : index
    %c16_265 = arith.constant 16 : index
    %333 = vector.load %arg7[%c0_264, %c16_265] : memref<1x256xf32, #tpu.memory_space<vmem>>, vector<1x16xf32>
    tpu.vector_store %arg7[%c0_264, %c16_265], %332 {strides = array<i32>} : memref<1x256xf32, #tpu.memory_space<vmem>>, vector<1x16xf32>,
    %c2_266 = arith.constant 2 : index
    %c0_267 = arith.constant 0 : index
    %334 = vector.load %arg8[%c2_266, %c0_267] : memref<16x16xf32, #tpu.memory_space<vmem>>, vector<1x16xf32>
    %c0_268 = arith.constant 0 : index
    %c32_269 = arith.constant 32 : index
    %335 = vector.load %arg7[%c0_268, %c32_269] : memref<1x256xf32, #tpu.memory_space<vmem>>, vector<1x16xf32>
    tpu.vector_store %arg7[%c0_268, %c32_269], %334 {strides = array<i32>} : memref<1x256xf32, #tpu.memory_space<vmem>>, vector<1x16xf32>,
    %c3_270 = arith.constant 3 : index
    %c0_271 = arith.constant 0 : index
    %336 = vector.load %arg8[%c3_270, %c0_271] : memref<16x16xf32, #tpu.memory_space<vmem>>, vector<1x16xf32>
    %c0_272 = arith.constant 0 : index
    %c48_273 = arith.constant 48 : index
    %337 = vector.load %arg7[%c0_272, %c48_273] : memref<1x256xf32, #tpu.memory_space<vmem>>, vector<1x16xf32>
    tpu.vector_store %arg7[%c0_272, %c48_273], %336 {strides = array<i32>} : memref<1x256xf32, #tpu.memory_space<vmem>>, vector<1x16xf32>,
    %c4_274 = arith.constant 4 : index
    %c0_275 = arith.constant 0 : index
    %338 = vector.load %arg8[%c4_274, %c0_275] : memref<16x16xf32, #tpu.memory_space<vmem>>, vector<1x16xf32>
    %c0_276 = arith.constant 0 : index
    %c64_277 = arith.constant 64 : index
    %339 = vector.load %arg7[%c0_276, %c64_277] : memref<1x256xf32, #tpu.memory_space<vmem>>, vector<1x16xf32>
    tpu.vector_store %arg7[%c0_276, %c64_277], %338 {strides = array<i32>} : memref<1x256xf32, #tpu.memory_space<vmem>>, vector<1x16xf32>,
    %c5_278 = arith.constant 5 : index
    %c0_279 = arith.constant 0 : index
    %340 = vector.load %arg8[%c5_278, %c0_279] : memref<16x16xf32, #tpu.memory_space<vmem>>, vector<1x16xf32>
    %c0_280 = arith.constant 0 : index
    %c80_281 = arith.constant 80 : index
    %341 = vector.load %arg7[%c0_280, %c80_281] : memref<1x256xf32, #tpu.memory_space<vmem>>, vector<1x16xf32>
    tpu.vector_store %arg7[%c0_280, %c80_281], %340 {strides = array<i32>} : memref<1x256xf32, #tpu.memory_space<vmem>>, vector<1x16xf32>,
    %c6_282 = arith.constant 6 : index
    %c0_283 = arith.constant 0 : index
    %342 = vector.load %arg8[%c6_282, %c0_283] : memref<16x16xf32, #tpu.memory_space<vmem>>, vector<1x16xf32>
    %c0_284 = arith.constant 0 : index
    %c96_285 = arith.constant 96 : index
    %343 = vector.load %arg7[%c0_284, %c96_285] : memref<1x256xf32, #tpu.memory_space<vmem>>, vector<1x16xf32>
    tpu.vector_store %arg7[%c0_284, %c96_285], %342 {strides = array<i32>} : memref<1x256xf32, #tpu.memory_space<vmem>>, vector<1x16xf32>,
    %c7_286 = arith.constant 7 : index
    %c0_287 = arith.constant 0 : index
    %344 = vector.load %arg8[%c7_286, %c0_287] : memref<16x16xf32, #tpu.memory_space<vmem>>, vector<1x16xf32>
    %c0_288 = arith.constant 0 : index
    %c112_289 = arith.constant 112 : index
    %345 = vector.load %arg7[%c0_288, %c112_289] : memref<1x256xf32, #tpu.memory_space<vmem>>, vector<1x16xf32>
    tpu.vector_store %arg7[%c0_288, %c112_289], %344 {strides = array<i32>} : memref<1x256xf32, #tpu.memory_space<vmem>>, vector<1x16xf32>,
    %c8_290 = arith.constant 8 : index
    %c0_291 = arith.constant 0 : index
    %346 = vector.load %arg8[%c8_290, %c0_291] : memref<16x16xf32, #tpu.memory_space<vmem>>, vector<1x16xf32>
    %c0_292 = arith.constant 0 : index
    %c128_293 = arith.constant 128 : index
    %347 = vector.load %arg7[%c0_292, %c128_293] : memref<1x256xf32, #tpu.memory_space<vmem>>, vector<1x16xf32>
    tpu.vector_store %arg7[%c0_292, %c128_293], %346 {strides = array<i32>} : memref<1x256xf32, #tpu.memory_space<vmem>>, vector<1x16xf32>,
    %c9_294 = arith.constant 9 : index
    %c0_295 = arith.constant 0 : index
    %348 = vector.load %arg8[%c9_294, %c0_295] : memref<16x16xf32, #tpu.memory_space<vmem>>, vector<1x16xf32>
    %c0_296 = arith.constant 0 : index
    %c144_297 = arith.constant 144 : index
    %349 = vector.load %arg7[%c0_296, %c144_297] : memref<1x256xf32, #tpu.memory_space<vmem>>, vector<1x16xf32>
    tpu.vector_store %arg7[%c0_296, %c144_297], %348 {strides = array<i32>} : memref<1x256xf32, #tpu.memory_space<vmem>>, vector<1x16xf32>,
    %c10_298 = arith.constant 10 : index
    %c0_299 = arith.constant 0 : index
    %350 = vector.load %arg8[%c10_298, %c0_299] : memref<16x16xf32, #tpu.memory_space<vmem>>, vector<1x16xf32>
    %c0_300 = arith.constant 0 : index
    %c160_301 = arith.constant 160 : index
    %351 = vector.load %arg7[%c0_300, %c160_301] : memref<1x256xf32, #tpu.memory_space<vmem>>, vector<1x16xf32>
    tpu.vector_store %arg7[%c0_300, %c160_301], %350 {strides = array<i32>} : memref<1x256xf32, #tpu.memory_space<vmem>>, vector<1x16xf32>,
    %c11_302 = arith.constant 11 : index
    %c0_303 = arith.constant 0 : index
    %352 = vector.load %arg8[%c11_302, %c0_303] : memref<16x16xf32, #tpu.memory_space<vmem>>, vector<1x16xf32>
    %c0_304 = arith.constant 0 : index
    %c176_305 = arith.constant 176 : index
    %353 = vector.load %arg7[%c0_304, %c176_305] : memref<1x256xf32, #tpu.memory_space<vmem>>, vector<1x16xf32>
    tpu.vector_store %arg7[%c0_304, %c176_305], %352 {strides = array<i32>} : memref<1x256xf32, #tpu.memory_space<vmem>>, vector<1x16xf32>,
    %c12_306 = arith.constant 12 : index
    %c0_307 = arith.constant 0 : index
    %354 = vector.load %arg8[%c12_306, %c0_307] : memref<16x16xf32, #tpu.memory_space<vmem>>, vector<1x16xf32>
    %c0_308 = arith.constant 0 : index
    %c192_309 = arith.constant 192 : index
    %355 = vector.load %arg7[%c0_308, %c192_309] : memref<1x256xf32, #tpu.memory_space<vmem>>, vector<1x16xf32>
    tpu.vector_store %arg7[%c0_308, %c192_309], %354 {strides = array<i32>} : memref<1x256xf32, #tpu.memory_space<vmem>>, vector<1x16xf32>,
    %c13_310 = arith.constant 13 : index
    %c0_311 = arith.constant 0 : index
    %356 = vector.load %arg8[%c13_310, %c0_311] : memref<16x16xf32, #tpu.memory_space<vmem>>, vector<1x16xf32>
    %c0_312 = arith.constant 0 : index
    %c208_313 = arith.constant 208 : index
    %357 = vector.load %arg7[%c0_312, %c208_313] : memref<1x256xf32, #tpu.memory_space<vmem>>, vector<1x16xf32>
    tpu.vector_store %arg7[%c0_312, %c208_313], %356 {strides = array<i32>} : memref<1x256xf32, #tpu.memory_space<vmem>>, vector<1x16xf32>,
    %c14_314 = arith.constant 14 : index
    %c0_315 = arith.constant 0 : index
    %358 = vector.load %arg8[%c14_314, %c0_315] : memref<16x16xf32, #tpu.memory_space<vmem>>, vector<1x16xf32>
    %c0_316 = arith.constant 0 : index
    %c224_317 = arith.constant 224 : index
    %359 = vector.load %arg7[%c0_316, %c224_317] : memref<1x256xf32, #tpu.memory_space<vmem>>, vector<1x16xf32>
    tpu.vector_store %arg7[%c0_316, %c224_317], %358 {strides = array<i32>} : memref<1x256xf32, #tpu.memory_space<vmem>>, vector<1x16xf32>,
    %c15_318 = arith.constant 15 : index
    %c0_319 = arith.constant 0 : index
    %360 = vector.load %arg8[%c15_318, %c0_319] : memref<16x16xf32, #tpu.memory_space<vmem>>, vector<1x16xf32>
    %c0_320 = arith.constant 0 : index
    %c240_321 = arith.constant 240 : index
    %361 = vector.load %arg7[%c0_320, %c240_321] : memref<1x256xf32, #tpu.memory_space<vmem>>, vector<1x16xf32>
    tpu.vector_store %arg7[%c0_320, %c240_321], %360 {strides = array<i32>} : memref<1x256xf32, #tpu.memory_space<vmem>>, vector<1x16xf32>,
    %c0_322 = arith.constant 0 : index
    %c0_323 = arith.constant 0 : index
    %362 = vector.load %arg7[%c0_322, %c0_323] : memref<1x256xf32, #tpu.memory_space<vmem>>, vector<1x256xf32>
    %363 = vector.broadcast %362 : vector<1x256xf32> to vector<32x256xf32>
    %364 = arith.mulf %31, %363 : vector<32x256xf32>
    %c0_324 = arith.constant 0 : index
    %c0_325 = arith.constant 0 : index
    %c0_326 = arith.constant 0 : index
    %365 = vector.load %arg5[%c0_324, %c0_325, %c0_326] : memref<1x32x256xf32, #tpu.memory_space<vmem>>, vector<1x32x256xf32>
    %366 = vector.shape_cast %365 : vector<1x32x256xf32> to vector<32x256xf32>
    %367 = vector.shape_cast %364 : vector<32x256xf32> to vector<1x32x256xf32>
    tpu.vector_store %arg5[%c0_324, %c0_325, %c0_326], %367 {strides = array<i32>} : memref<1x32x256xf32, #tpu.memory_space<vmem>>, vector<1x32x256xf32>,
    return
  }
  func.func @transform_0(%arg0: i32) -> (i32, i32, i32) {
    %c0_i32 = arith.constant 0 : i32
    %c0_i32_0 = arith.constant 0 : i32
    %c0_i32_1 = arith.constant 0 : i32
    return %arg0, %c0_i32, %c0_i32_0 : i32, i32, i32
  }
  func.func @transform_1(%arg0: i32) -> (i32, i32) {
    %c0_i32 = arith.constant 0 : i32
    %c0_i32_0 = arith.constant 0 : i32
    %c0_i32_1 = arith.constant 0 : i32
    return %c0_i32, %c0_i32_0 : i32, i32
  }
  func.func @transform_2(%arg0: i32) -> (i32, i32) {
    %c0_i32 = arith.constant 0 : i32
    %c0_i32_0 = arith.constant 0 : i32
    %c0_i32_1 = arith.constant 0 : i32
    return %c0_i32, %c0_i32_0 : i32, i32
  }
  func.func @transform_3(%arg0: i32) -> (i32, i32) {
    %c0_i32 = arith.constant 0 : i32
    %c0_i32_0 = arith.constant 0 : i32
    %c0_i32_1 = arith.constant 0 : i32
    return %c0_i32, %c0_i32_0 : i32, i32
  }
  func.func @transform_4(%arg0: i32) -> (i32, i32, i32) {
    %c0_i32 = arith.constant 0 : i32
    %c0_i32_0 = arith.constant 0 : i32
    %c0_i32_1 = arith.constant 0 : i32
    return %arg0, %c0_i32, %c0_i32_0 : i32, i32, i32
  }
}

</mosaic_0001>

<bundles_post_ra>
// kernel: tpu_custom_call.1
= control target key start
LH: loop header
LB: loop body
LE: loop exit
PB: predicated region body
PF: predicated region fallthrough
CT: control target
= control target key end

     0   :  { %9 = vsyncpa [#allocation6], 0  ;;  %s2927_s0 = inlined_call_operand.hbm [shape: f32[2,32,256], index: 0, kind: input, shape index: {}]   ;;  %s2928_s1 = inlined_call_operand.vmem [shape: f32[32,2], index: 1, kind: input, shape index: {}]   ;;  %s2929_s2 = inlined_call_operand.vmem [shape: f32[32,2], index: 2, kind: input, shape index: {}]   ;;  %s2930_s3 = inlined_call_operand.vmem [shape: f32[7,7], index: 3, kind: input, shape index: {}]   ;;  %s2931_s4 = inlined_call_operand.hbm [shape: f32[2,32,256], index: 4, kind: output, shape index: {}]  }
   0x1   :  { %11 = vsyncpa [#allocation6 + $0x1], 0 }
   0x2   :  { %12 = vsyncpa [#allocation8], 0 }
   0x3   :  { %13 = vsyncpa [#allocation7], 0 }
   0x4   :  { %15 = vsyncpa [#allocation7 + $0x1], 0  ;;  %s2049_s15 = smov 0   ;;  %s2051_s16 = smov 0  }
   0x5   :  { %s2053_s17 = smov 0   ;;  %s2055_s18 = smov 0  }
   0x6 LB: > { %s2070_s19 = sadd.s32 4294967295, %s1993_s18   ;;  %s1675_s20 = sadd.s32 4294967294, %s1993_s18   ;;  %s1993_s18 = sphi %s2055_s18, %s2989_s18   ;;  %s1989_s17 = sphi %s2053_s17, %s2988_s17   ;;  %s1985_s16 = sphi %s2051_s16, %s2987_s16   ;;  %s1981_s15 = sphi %s2049_s15, %s2986_s15  }
   0x7   : > { %s2074_s21 = sadd.s32 1, %s1993_s18   ;;  %s28_s22 = sadd.s32 1, %s1989_s17 }
   0x8   : > { %s25_s23 = ssub.s32 %s1993_s18, %s2074_s21  ;;  %p35_p0 = scmp.ne.s32.totalorder %s1989_s17, %s1985_s16 }
   0x9   : > { %p26_p1 = scmp.eq.s32.totalorder %s25_s23, 0  ;;  %p36_p2 = scmp.eq.s32.totalorder %s1993_s18, 0 }
   0xa   : > { %p41_p3 = scmp.ne.s32.totalorder %s1985_s16, %s1981_s15  ;;  %p2933_p4 = scmp.eq.s32.totalorder %s2070_s19, 0 }
   0xb   : > { %s2086_s24 = scalar_select %p26_p1, %s1989_s17, %s28_s22  }
   0xc   : > { %p2088_p5 = por %p36_p2, %p35_p0  ;;  %p2094_p6 = por %p2933_p4, %p41_p3 }
   0xd   : > { %p128_p7 = scmp.eq.s32.totalorder %s2070_s19, 1  ;;  %p134_p8 = scmp.eq.s32.totalorder %s1675_s20, 1 }
   0xe   : > { %s2940_s26 = scalar_select %p2094_p6, 1, 0 }
   0xf   : > { %p1676_p9 = scmp.ge.s32.totalorder %s1993_s18, 1  ;;  %p141_p10 = scmp.lt.s32.totalorder %s1993_s18, 3 }
  0x10   : > { %p2101_p11 = por %p128_p7, %p35_p0  ;;  %p2105_p12 = por %p134_p8, %p41_p3 }
  0x11   : > { %p2109_p13 = pnand %p1676_p9, %p141_p10  ;;  %s160_s6 = sshll.u32 %s2930_s3, 4  ;;  %s161_s6 = int_to_ptr.vmem [resolvable:$true] %s160_s6 }
  0x12   : > { %s2941_s27 = scalar_select %p2101_p11, 1, 0 }
  0x13   : > { %s2942_s28 = scalar_select %p2105_p12, 1, 0 }
  0x14   : > { %p1779_p1 = pneg %p2109_p13  ;;  %p1792_p2 = scmp.lt.s32.totalorder %s1993_s18, 2 }
  0x15   : > { %s171_s8 = sand.u32 1, %s1989_s17   ;;  %s1878_s11 = scalar_lea.vmem %s161_s6, 128 }
  0x16   : > { %p2122_p7 = pnand %p1779_p1, %p2933_p4  ;;  %p2129_p3 = pnand %p1792_p2, %p2088_p5 }
  0x17   : > { %s1679_s10 = sshll.u32 %s171_s8, 6  ;;  %p1879_p8 = scmp.ne.s32.totalorder %s161_s6, %s1878_s11 }
  0x18   : > { %p1880_p9 = pneg %p2122_p7  ;;  %p1886_p12 = scmp.lt.s32.totalorder %s161_s6, %s161_s6 }
  0x19   : > { %p1887_p11 = scmp.lt.s32.totalorder %s1878_s11, %s1878_s11 }
  0x1a   : > { %p1881_p10 = pnand %p1880_p9, %p1879_p8 }
  0x1b   : > { %p1888_p1 = por %p1887_p11, %p1886_p12 }
  0x1c   : > { %p1882_p0 = pneg %p1881_p10 }
  0x1e   : > { %p1889_p4 = pnand %p1888_p1, %p1882_p0 }
  0x20   : > { %1892 = shalt.err (!%p1889_p4)
}
  0x21   : > { %s1995_s12 = smov [#allocation9]   ;;  %s1769_s13 = sshll.u32 %s1993_s18, 10 }
  0x22   : > { %1782 = dma.vmem_to_smem (!%p2122_p7), %s161_s6, 128, %s1995_s12, [#allocation8]  }
  0x23   : > { %s175_s14 = scalar_lea.vmem [#allocation5], %s1679_s10  ;;  %s2141_s25 = scalar_lea.hbm %s2927_s0, %s1769_s13 }
  0x24   : > { %s182_s20 = sshll.u32 %s175_s14, 4  ;;  %s2145_s30 = scalar_lea.sflag [#allocation6], %s171_s8  ;;  %s2143_s20 = int_to_ptr.vmem [resolvable:$true] %s182_s20 }
  0x25   : > { %s1893_s5 = scalar_lea.hbm %s2141_s25, 1024  ;;  %p1895_p5 = pneg %p2129_p3 }
  0x26   : > { %p1894_p4 = scmp.ne.s32.totalorder %s2141_s25, %s1893_s5  ;;  %s1898_s10 = scalar_lea.hbm %s2927_s0, 2048 }
  0x27   : > { %p1899_p0 = scmp.lt.u32.totalorder %s2141_s25, %s2927_s0  ;;  %p1900_p2 = scmp.lt.u32.totalorder %s1898_s10, %s1893_s5 }
  0x28   : > { %p1896_p11 = pnand %p1895_p5, %p1894_p4  ;;  %p1902_p8 = scmp.lt.u32.totalorder %s1893_s5, %s2141_s25 }
  0x29   : > { %p1901_p7 = por %p1900_p2, %p1899_p0 }
  0x2a   : > { %p1897_p12 = pneg %p1896_p11 }
  0x2b   : > { %p1903_p9 = por %p1902_p8, %p1901_p7 }
  0x2d   : > { %p1904_p10 = pnand %p1903_p9, %p1897_p12 }
  0x2f   : > { %1907 = shalt.err (!%p1904_p10)
}
  0x30   : > { %s1908_s8 = scalar_lea.vmem %s2143_s20, 1024  ;;  %s1996_s13 = smov [#allocation5]  }
  0x31   : > { %p1909_p1 = scmp.ne.s32.totalorder %s2143_s20, %s1908_s8  ;;  %s1913_s14 = sshll.u32 %s1996_s13, 4  ;;  %s1914_s14 = int_to_ptr.vmem [resolvable:$false] %s1913_s14 }
  0x32   : > { %s1915_s22 = scalar_lea.vmem %s1914_s14, 2048  ;;  %p1916_p6 = scmp.lt.s32.totalorder %s2143_s20, %s1914_s14 }
  0x33   : > { %p1911_p4 = pnand %p1909_p1, %p1895_p5  ;;  %p1917_p0 = scmp.lt.s32.totalorder %s1915_s22, %s1908_s8 }
  0x35   : > { %p1912_p11 = pneg %p1911_p4  ;;  %p1918_p2 = por %p1917_p0, %p1916_p6 }
  0x37   : > { %p1919_p7 = pnand %p1918_p2, %p1912_p11 }
  0x39   : > { %1922 = shalt.err (!%p1919_p7)
}
  0x3a   : > { %s1997_s23 = smov 256   ;;  %s1998_s5 = smov 16  }
  0x3b   : > { %1786 = dma.hbm_to_vmem [thread:$0]  (!%p2129_p3), %s2141_s25, 1024, %s2143_s20, %s2145_s30, %s1997_s23, %s1997_s23, %s1998_s5  }
  0x3c   : > { %194 = sbr.rel (%p2109_p13) target bundleno = 1110 (0x456), region = 36  ;;  %s2176_s6 = sand.u32 (!%p2109_p13), 1, %s1985_s16  }
  0x3d   : > { %s1683_s7 = sshll.u32 (!%p2109_p13), %s2176_s6, 6  ;;  %s197_s10 = scalar_lea.sflag (!%p2109_p13), [#allocation6], %s2176_s6 }
  0x3e   : > { %s200_s11 = scalar_lea.vmem (!%p2109_p13), [#allocation5], %s1683_s7  ;;  %p2946_p6 = scmp.ne.s32.totalorder (!%p2109_p13), %s2940_s26, 0 }
  0x43   : > { %1968 = dma.done.wait (%p2946_p6), %s197_s10, 1024  }
  0x44   : > { %1970 = vsyncadd (%p2946_p6), %s197_s10, 4294966272  ;;  %p2947_p3 = scmp.eq.s32.totalorder %s2070_s19, 0 }
  0x46   : > { %1972 = dma.done.wait (%p2947_p3), [#allocation8], 128   ;;  %p2948_p13 = pmov %p2947_p3 }
  0x48   : > { %1974 = vsyncadd (%p2948_p13), [#allocation8], 4294967168 }
  0x49   : > { %209 = sfence }
  0x4a   : > { %v2190_v0 = vld [vmem:[%s200_s11 + $0x20] sm:$0xff]  ;;  %v2192_v1 = vld [vmem:[%s200_s11 + $0x28] sm:$0xff]  ;;  %v2200_v5 = vld [vmem:[%s200_s11 + $0x10] sm:$0xff]  ;;  %vm287_vm0 = vcmask 15360   ;;  %vm416_vm1 = vcmask 179200   ;;  %s2001_s29 = smov 115  }
  0x4b   : > { %v2194_v2 = vld [vmem:[%s200_s11] sm:$0xff]  ;;  %v244_v3 = vadd.f32 %v2192_v1, %v2190_v0  ;;  %v2198_v4 = vld [vmem:[%s200_s11 + $0x8] sm:$0xff]  ;;  %v2202_v6 = vld [vmem:[%s200_s11 + $0x18] sm:$0xff]  ;;  %v261_v15 = vmax.f32 %v2190_v0, %v2192_v1  ;;  %s2002_s9 = smov 3   ;;  %s2003_s20 = smov 99   ;;  %vm419_vm3 = vcmask 177152  }
  0x4c   : > { %v238_v7 = vadd.f32 %v2198_v4, %v2194_v2  ;;  %v255_v8 = vmax.f32 %v2194_v2, %v2198_v4  ;;  %v241_v9 = vadd.f32 %v2202_v6, %v2200_v5  ;;  %v2210_v10 = vld [vmem:[%s200_s11 + $0x30] sm:$0xff]  ;;  %v2212_v11 = vld [vmem:[%s200_s11 + $0x38] sm:$0xff]  ;;  %v258_v13 = vmax.f32 %v2200_v5, %v2202_v6  ;;  %v277_v40 = vld [vmem:[%s2928_s1 + $0x10] sm:$0xff]  ;;  %s2004_s25 = smov 67   ;;  %s2005_s30 = smov 83  }
  0x4d   : > { %245 = vadd.xlane.f32.xlu1 %v244_v3  ;;  %v247_v12 = vadd.f32 %v2212_v11, %v2210_v10  ;;  %v264_v14 = vmax.f32 %v2210_v10, %v2212_v11  ;;  %v275_v28 = vld [vmem:[%s2928_s1] sm:$0xff]  ;;  %v276_v29 = vld [vmem:[%s2928_s1 + $0x8] sm:$0xff]  ;;  %v278_v38 = vld [vmem:[%s2928_s1 + $0x18] sm:$0xff]  ;;  %s2006_s12 = smov 35   ;;  %s2007_s8 = smov 51   ;;  %vm430_vm4 = vcmask 147480  }
  0x4e   : > { %239 = vadd.xlane.f32.xlu0 %v238_v7  ;;  %v280_v57 = vld [vmem:[%s2929_s2 + $0x8] sm:$0xff]  ;;  %v279_v58 = vld [vmem:[%s2929_s2] sm:$0xff]  ;;  %v282_v60 = vld [vmem:[%s2929_s2 + $0x18] sm:$0xff]  ;;  %s2008_s13 = smov 19   ;;  %s2310_s14 = sld [smem:[#allocation9 + $0x1]]  ;;  %vm1238_vm5 = vcmask 130048  }
  0x4f   : > { %v281_v61 = vld [vmem:[%s2929_s2 + $0x10] sm:$0xff]  ;;  %s2314_s22 = sld [smem:[#allocation9 + $0x2]]  ;;  %s2319_s23 = sld [smem:[#allocation9 + $0x3]] }
  0x50   : > { %s2327_s5 = sld [smem:[#allocation9 + $0x4]]  ;;  %s2009_s10 = smov 127  }
  0x51   : > { %256 = vmax.xlane.f32.xlu1 %v255_v8  ;;  %s2334_s11 = sld [smem:[#allocation9 + $0x5]]  ;;  %s2010_s26 = smov 126  }
  0x52   : > { %242 = vadd.xlane.f32.xlu0 %v241_v9  ;;  %p2983_p12 = scmp.ne.s32.totalorder %s2941_s27, 0 }
  0x55   : > { %248 = vadd.xlane.f32.xlu1 %v247_v12 }
  0x56   : > { %259 = vmax.xlane.f32.xlu0 %v258_v13 }
  0x59   : > { %265 = vmax.xlane.f32.xlu1 %v264_v14  ;;  %v1999_v14 = vmov 0.0  }
  0x5a   : > { %262 = vmax.xlane.f32.xlu0 %v261_v15  ;;  %417 = vst.msk [vmem:[#allocation2] sm:$0xff] %vm416_vm1, %v1999_v14  ;;  %418 = vst.msk [vmem:[#allocation2 + $0x8] sm:$0xff] %vm416_vm1, %v1999_v14 }
  0x5b   : > { %420 = vst.msk [vmem:[#allocation2 + $0x10] sm:$0x3f] %vm419_vm3, %v1999_v14 }
  0xda   : > { %v246_v16 = vpop.xlane.xlu1 %245 }
  0xdb   : > { %v240_v17 = vpop.xlane.xlu0 %239  ;;  %v253_v30 = vmul.f32 0.00390625, %v246_v16 }
  0xdc   : > { %v251_v18 = vmul.f32 0.00390625, %v240_v17 }
  0xde   : > { %v257_v19 = vpop.xlane.xlu1 %256 }
  0xdf   : > { %v243_v20 = vpop.xlane.xlu0 %242  ;;  %v267_v21 = vadd.f32 %v257_v19, %v251_v18 }
  0xe0   : > { %v252_v22 = vmul.f32 0.00390625, %v243_v20 }
  0xe1   : > { %v271_v26 = vmul.f32 0.5, %v267_v21 }
  0xe2   : > { %v249_v23 = vpop.xlane.xlu1 %248 }
  0xe3   : > { %v254_v24 = vmul.f32 0.00390625, %v249_v23  ;;  %v260_v25 = vpop.xlane.xlu0 %259  ;;  %v283_v35 = vmul.f32 %v275_v28, %v271_v26 }
  0xe4   : > { %v268_v27 = vadd.f32 %v260_v25, %v252_v22 }
  0xe5   : > { %v288_v43 = vsel %vm287_vm0, %v283_v35, 0.0 }
  0xe6   : > { %v272_v31 = vmul.f32 0.5, %v268_v27  ;;  %v266_v32 = vpop.xlane.xlu1 %265 }
  0xe7   : > { %v270_v33 = vadd.f32 %v266_v32, %v254_v24  ;;  %v263_v34 = vpop.xlane.xlu0 %262 }
  0xe8   : > { %v284_v36 = vmul.f32 %v276_v29, %v272_v31  ;;  %v269_v37 = vadd.f32 %v263_v34, %v253_v30 }
  0xe9   : > { %v274_v39 = vmul.f32 0.5, %v270_v33 }
  0xea   : > { %v289_v41 = vsel %vm287_vm0, %v284_v36, 0.0  ;;  %v273_v42 = vmul.f32 0.5, %v269_v37 }
  0xeb   : > { %v286_v44 = vmul.f32 %v278_v38, %v274_v39  ;;  %v290_v46 = vadd.f32 %v289_v41, %v288_v43 }
  0xec   : > { %v285_v45 = vmul.f32 %v277_v40, %v273_v42 }
  0xed   : > { %v293_v49 = vsel %vm287_vm0, %v286_v44, 0.0 }
  0xee   : > { %v291_v47 = vsel %vm287_vm0, %v285_v45, 0.0 }
  0xef   : > { %v292_v48 = vadd.f32 %v291_v47, %v290_v46 }
  0xf1   : > { %v294_v50 = vadd.f32 %v293_v49, %v292_v48 }
  0xf3   : > { %v295_v51 = vrot.slane %v294_v50, 4 }
  0xf5   : > { %v296_v52 = vadd.f32 %v295_v51, %v294_v50 }
  0xf7   : > { %v297_v53 = vrot.slane %v296_v52, 2 }
  0xf9   : > { %v298_v54 = vadd.f32 %v297_v53, %v296_v52 }
  0xfb   : > { %v299_v55 = vrot.slane %v298_v54, 1 }
  0xfd   : > { %v300_v56 = vadd.f32 %v299_v55, %v298_v54 }
  0xff   : > { %v301_v59 = vmax.f32 %v300_v56, 0.0 }
 0x101   : > { %v303_v62 = vmul.f32 %v301_v59, %v280_v57  ;;  %v302_v63 = vmul.f32 %v301_v59, %v279_v58  ;;  %v305_v8 = vmul.f32 %v301_v59, %v282_v60  ;;  %v304_v9 = vmul.f32 %v301_v59, %v281_v61 }
 0x103   : > { %v309_v3 = vsel %vm287_vm0, %v303_v62, 0.0  ;;  %v306_v7 = vsel %vm287_vm0, %v302_v63, 0.0  ;;  %v315_v12 = vsel %vm287_vm0, %v305_v8, 0.0  ;;  %v312_v13 = vsel %vm287_vm0, %v304_v9, 0.0 }
 0x104   : > { %310 = vadd.xlane.f32.xlu1 %v309_v3  ;;  %307 = vadd.xlane.f32.xlu0 %v306_v7  ;;  %v2000_v9 = vmov 1966171168  }
 0x108   : > { %316 = vadd.xlane.f32.xlu1 %v315_v12  ;;  %313 = vadd.xlane.f32.xlu0 %v312_v13  ;;  %v397_v12 = vunpack.c.l.s4 %v2000_v9  ;;  %v399_v13 = vlaneseq }
 0x10a   : > { %vm413_vm2 = vcmp.lt.s32.totalorder %v399_v13, 256  ;;  %vm2681_vm6 = vcmp.lt.s32.totalorder %v399_v13, 16  ;;  %vm2707_vm7 = vcmp.ge.s32.totalorder %v399_v13, 16  ;;  %vm2712_vm8 = vcmp.lt.s32.totalorder %v399_v13, 32 }
 0x10b   : > { %vm1266_vm9 = vmand %vm2707_vm7, %vm2712_vm8  ;;  %vm2721_vm10 = vcmp.ge.s32.totalorder %v399_v13, 32  ;;  %vm2726_vm11 = vcmp.lt.s32.totalorder %v399_v13, 48  ;;  %vm2740_vm13 = vcmp.ge.s32.totalorder %v399_v13, 48  ;;  %vm2745_vm14 = vcmp.lt.s32.totalorder %v399_v13, 64 }
 0x10c   : > { %vm2937_vm12 = vmand %vm2721_vm10, %vm2726_vm11  ;;  %vm2759_vm0 = vcmp.ge.s32.totalorder %v399_v13, 64  ;;  %vm2764_vm1 = vcmp.lt.s32.totalorder %v399_v13, 80  ;;  %vm2778_vm3 = vcmp.ge.s32.totalorder %v399_v13, 80 }
 0x10d   : > { %vm2935_vm15 = vmand %vm2740_vm13, %vm2745_vm14 }
 0x10e   : > { %vm2979_vm7 = vmand %vm2721_vm10, %vm2726_vm11 }
 0x191   : > { %v311_v15 = vpop.xlane.xlu1 %310  ;;  %v308_v16 = vpop.xlane.xlu0 %307 }
 0x192   : > { %v319_v17 = vsub.f32 0.0, %v311_v15  ;;  %v318_v18 = vsub.f32 0.0, %v308_v16 }
 0x194   : > { %v324_v19 = vmul.f32 1.442695, %v319_v17  ;;  %v322_v20 = vmul.f32 1.442695, %v318_v18 }
 0x195   : > { %v317_v21 = vpop.xlane.xlu1 %316  ;;  %v314_v22 = vpop.xlane.xlu0 %313 }
 0x196   : > { %1854 = vpow2.f32 %v324_v19  ;;  %v321_v23 = vsub.f32 0.0, %v317_v21  ;;  %v320_v24 = vsub.f32 0.0, %v314_v22  ;;  %v398_v21 = vunpack.c.0.s8 %v397_v12 }
 0x197   : > { %1856 = vpow2.f32 %v322_v20  ;;  %v2297_v22 = vshrl.u32 %v399_v13, 7 }
 0x198   : > { %v328_v25 = vmul.f32 1.442695, %v321_v23  ;;  %v326_v26 = vmul.f32 1.442695, %v320_v24 }
 0x19a   : > { %1858 = vpow2.f32 %v328_v25 }
 0x19b   : > { %1860 = vpow2.f32 %v326_v26 }
 0x1a0   : > { %v1855_v27 = vpop.eup %1854 }
 0x1a1   : > { %v1857_v28 = vpop.eup %1856  ;;  %v331_v29 = vadd.f32 1.0, %v1855_v27 }
 0x1a2   : > { %v330_v30 = vadd.f32 1.0, %v1857_v28 }
 0x1a3   : > { %1862 = vrcp.f32 %v331_v29  ;;  %v2300_v29 = vsub.s32 %v398_v21, %v2297_v22 }
 0x1a4   : > { %v1859_v31 = vpop.eup %1858  ;;  %1864 = vrcp.f32 %v330_v30 }
 0x1a5   : > { %v1861_v32 = vpop.eup %1860  ;;  %v333_v33 = vadd.f32 1.0, %v1859_v31 }
 0x1a6   : > { %v332_v34 = vadd.f32 1.0, %v1861_v32 }
 0x1a7   : > { %1866 = vrcp.f32 %v333_v33 }
 0x1a8   : > { %1868 = vrcp.f32 %v332_v34 }
 0x1ad   : > { %v1863_v35 = vpop.eup %1862 }
 0x1ae   : > { %v1865_v36 = vpop.eup %1864  ;;  %v2257_v37 = vmul.f32 %v1863_v35, %v2200_v5  ;;  %v2260_v38 = vmul.f32 %v1863_v35, %v2202_v6 }
 0x1af   : > { %v2263_v39 = vmul.f32 %v1865_v36, %v2194_v2  ;;  %v2266_v40 = vmul.f32 %v1865_v36, %v2198_v4 }
 0x1b1   : > { %v1867_v41 = vpop.eup %1866  ;;  %v350_v5 = vadd.f32 %v2257_v37, %v2263_v39  ;;  %v359_v6 = vadd.f32 %v2260_v38, %v2266_v40 }
 0x1b2   : > { %v1869_v42 = vpop.eup %1868  ;;  %v2269_v43 = vmul.f32 %v1867_v41, %v2210_v10  ;;  %v2272_v44 = vmul.f32 %v1867_v41, %v2212_v11 }
 0x1b3   : > { %v2279_v2 = vmul.f32 %v1869_v42, %v2190_v0  ;;  %v2282_v4 = vmul.f32 %v1869_v42, %v2192_v1 }
 0x1b4   : > { %v372_v45 = vmax.f32 %v2257_v37, %v2269_v43  ;;  %v381_v10 = vmax.f32 %v2260_v38, %v2272_v44 }
 0x1b5   : > { %v351_v11 = vadd.f32 %v350_v5, %v2279_v2  ;;  %v360_v46 = vadd.f32 %v359_v6, %v2282_v4  ;;  %v371_v47 = vmax.f32 %v2263_v39, %v2279_v2  ;;  %v380_v0 = vmax.f32 %v2266_v40, %v2282_v4 }
 0x1b7   : > { %v352_v48 = vadd.f32 %v351_v11, %v2269_v43  ;;  %v361_v1 = vadd.f32 %v360_v46, %v2272_v44  ;;  %v373_v49 = vmax.f32 %v371_v47, %v372_v45  ;;  %v382_v50 = vmax.f32 %v380_v0, %v381_v10 }
 0x1b8   : > { %v591_v46 = vstv %s2310_s14  ;;  %s2372_s14 = sld [smem:[#allocation9 + $0x84]] }
 0x1b9   : > { %v353_v51 = vrot.slane %v352_v48, 4  ;;  %v362_v52 = vrot.slane %v361_v1, 4  ;;  %v374_v53 = vrot.slane %v373_v49, 4  ;;  %v383_v54 = vrot.slane %v382_v50, 4 }
 0x1bb   : > { %v354_v55 = vadd.f32 %v353_v51, %v352_v48  ;;  %v363_v56 = vadd.f32 %v362_v52, %v361_v1  ;;  %v375_v57 = vmax.f32 %v373_v49, %v374_v53  ;;  %v384_v58 = vmax.f32 %v382_v50, %v383_v54 }
 0x1bc   : > { %v605_v49 = vstv %s2314_s22  ;;  %v619_v53 = vstv %s2319_s23  ;;  %s2379_s22 = sld [smem:[#allocation9 + $0x85]]  ;;  %s2386_s23 = sld [smem:[#allocation9 + $0x86]] }
 0x1bd   : > { %v355_v59 = vrot.slane %v354_v55, 2  ;;  %v364_v60 = vrot.slane %v363_v56, 2  ;;  %v376_v61 = vrot.slane %v375_v57, 2  ;;  %v385_v62 = vrot.slane %v384_v58, 2 }
 0x1bf   : > { %v356_v63 = vadd.f32 %v355_v59, %v354_v55  ;;  %v365_v3 = vadd.f32 %v364_v60, %v363_v56  ;;  %v377_v7 = vmax.f32 %v375_v57, %v376_v61  ;;  %v386_v8 = vmax.f32 %v384_v58, %v385_v62 }
 0x1c0   : > { %v633_v57 = vstv %s2327_s5  ;;  %v647_v60 = vstv %s2334_s11  ;;  %s2395_s5 = sld [smem:[#allocation9 + $0x101]]  ;;  %s2402_s11 = sld [smem:[#allocation9 + $0x102]] }
 0x1c1   : > { %v357_v15 = vrot.slane %v356_v63, 1  ;;  %v366_v16 = vrot.slane %v365_v3, 1  ;;  %v378_v17 = vrot.slane %v377_v7, 1  ;;  %v387_v18 = vrot.slane %v386_v8, 1 }
 0x1c3   : > { %v358_v19 = vadd.f32 %v357_v15, %v356_v63  ;;  %v367_v20 = vadd.f32 %v366_v16, %v365_v3  ;;  %v379_v25 = vmax.f32 %v377_v7, %v378_v17  ;;  %v388_v26 = vmax.f32 %v386_v8, %v387_v18 }
 0x1c5   : > { %v369_v23 = vmul.f32 0.03125, %v358_v19  ;;  %v370_v24 = vmul.f32 0.03125, %v367_v20 }
 0x1c7   : > { %v389_v27 = vadd.f32 %v379_v25, %v369_v23  ;;  %v390_v28 = vadd.f32 %v388_v26, %v370_v24  ;;  %v725_v25 = vstv %s2372_s14  ;;  %s2441_s14 = sld [smem:[#allocation9 + $0x181]] }
 0x1c9   : > { %v391_v30 = vmul.f32 0.5, %v389_v27  ;;  %v392_v31 = vmul.f32 0.5, %v390_v28  ;;  %v739_v28 = vstv %s2379_s22  ;;  %s2448_s22 = sld [smem:[#allocation9 + $0x182]] }
 0x1cb   : > { %v395_v32 = vcombine.low %v391_v30, %v392_v31 }
 0x1cd   : > { %v402_v33 = vrot.slane %v395_v32, %v2300_v29 }
 0x1cf   : > { %v409_v34 = vrot.slane %v402_v33, %v2300_v29  ;;  %v753_v33 = vstv %s2386_s23  ;;  %s2457_s23 = sld [smem:[#allocation9 + $0x183]] }
 0x1d1   : > { %415 = vst.msk [vmem:[#allocation3] sm:$0x3] %vm413_vm2, %v409_v34  ;;  %vm2936_vm2 = vmand %vm2759_vm0, %vm2764_vm1 }
 0x1d8   : > { %v1687_v35 = vld [vmem:[#allocation3] ss:$0 sm:$0xff]  ;;  %v1694_v36 = vld [vmem:[#allocation3 + $0x1] ss:$0 sm:$0xff] }
 0x1d9   : > { %438 = vrot.lane.b32.xlu1 %v1687_v35, %s2001_s29  ;;  %427 = vrot.lane.b32.xlu0 %v1687_v35, %s2002_s9 }
 0x1dd   : > { %448 = vrot.lane.b32.xlu1 %v1687_v35, %s2003_s20  ;;  %468 = vrot.lane.b32.xlu0 %v1687_v35, %s2004_s25 }
 0x1e1   : > { %458 = vrot.lane.b32.xlu1 %v1687_v35, %s2005_s30  ;;  %488 = vrot.lane.b32.xlu0 %v1687_v35, %s2006_s12 }
 0x1e5   : > { %478 = vrot.lane.b32.xlu1 %v1687_v35, %s2007_s8  ;;  %508 = vrot.lane.b32.xlu0 %v1694_v36, %s2002_s9  ;;  %s2011_s9 = smov 125  }
 0x1e9   : > { %498 = vrot.lane.b32.xlu1 %v1687_v35, %s2008_s13  ;;  %528 = vrot.lane.b32.xlu0 %v1694_v36, %s2003_s20  ;;  %s2347_s20 = sld [smem:[#allocation9 + $0x81]] }
 0x1ed   : > { %518 = vrot.lane.b32.xlu1 %v1694_v36, %s2001_s29  ;;  %548 = vrot.lane.b32.xlu0 %v1694_v36, %s2004_s25  ;;  %s2341_s29 = sld [smem:[#allocation9 + $0x6]]  ;;  %s2012_s25 = smov 124  }
 0x1ef   : > { %v683_v15 = vstv %s2347_s20  ;;  %s2418_s20 = sld [smem:[#allocation9 + $0x104]] }
 0x1f1   : > { %538 = vrot.lane.b32.xlu1 %v1694_v36, %s2005_s30  ;;  %568 = vrot.lane.b32.xlu0 %v1694_v36, %s2006_s12  ;;  %s2356_s30 = sld [smem:[#allocation9 + $0x82]]  ;;  %s2013_s12 = smov 123  }
 0x1f3   : > { %v661_v7 = vstv %s2341_s29  ;;  %s2411_s29 = sld [smem:[#allocation9 + $0x103]] }
 0x1f5   : > { %558 = vrot.lane.b32.xlu1 %v1694_v36, %s2007_s8  ;;  %s2365_s8 = sld [smem:[#allocation9 + $0x83]] }
 0x1f7   : > { %v697_v18 = vstv %s2356_s30  ;;  %s2425_s30 = sld [smem:[#allocation9 + $0x105]] }
 0x1f9   : > { %578 = vrot.lane.b32.xlu1 %v1694_v36, %s2008_s13  ;;  %s2014_s13 = smov 122  }
 0x1fb   : > { %v711_v21 = vstv %s2365_s8  ;;  %s2432_s8 = sld [smem:[#allocation9 + $0x106]] }
 0x24b   : > { %v439_v41 = vpop.permute.xlu1 %438  ;;  %v428_v42 = vpop.permute.xlu0 %427 }
 0x24c   : > { %441 = vst.msk [vmem:[#allocation2 + $0x4] sm:$0x1] %vm430_vm4, %v439_v41  ;;  %431 = vst.msk [vmem:[#allocation2 + $0x3] sm:$0x1] %vm430_vm4, %v428_v42  ;;  %v775_v41 = vstv %s2395_s5  ;;  %s2464_s5 = sld [smem:[#allocation9 + $0x184]] }
 0x24f   : > { %v449_v14 = vpop.permute.xlu1 %448  ;;  %v469_v5 = vpop.permute.xlu0 %468 }
 0x250   : > { %451 = vst.msk [vmem:[#allocation2 + $0x5] sm:$0x1] %vm430_vm4, %v449_v14  ;;  %471 = vst.msk [vmem:[#allocation2 + $0x7] sm:$0x1] %vm430_vm4, %v469_v5  ;;  %v789_v5 = vstv %s2402_s11  ;;  %s2471_s11 = sld [smem:[#allocation9 + $0x185]] }
 0x253   : > { %v459_v6 = vpop.permute.xlu1 %458  ;;  %v489_v45 = vpop.permute.xlu0 %488 }
 0x254   : > { %461 = vst.msk [vmem:[#allocation2 + $0x6] sm:$0x1] %vm430_vm4, %v459_v6  ;;  %491 = vst.msk [vmem:[#allocation2 + $0x9] sm:$0x1] %vm430_vm4, %v489_v45 }
 0x257   : > { %v479_v10 = vpop.permute.xlu1 %478  ;;  %v509_v11 = vpop.permute.xlu0 %508 }
 0x258   : > { %481 = vst.msk [vmem:[#allocation2 + $0x8] sm:$0x1] %vm430_vm4, %v479_v10  ;;  %511 = vst.msk [vmem:[#allocation2 + $0xb] sm:$0x1] %vm430_vm4, %v509_v11  ;;  %v803_v10 = vstv %s2411_s29  ;;  %s2478_s29 = sld [smem:[#allocation9 + $0x186]] }
 0x25b   : > { %v499_v47 = vpop.permute.xlu1 %498  ;;  %v529_v0 = vpop.permute.xlu0 %528  ;;  %v2321_v48 = vld [vmem:[#allocation2] sm:$0xff] }
 0x25c   : > { %501 = vst.msk [vmem:[#allocation2 + $0xa] sm:$0x1] %vm430_vm4, %v499_v47  ;;  %531 = vst.msk [vmem:[#allocation2 + $0xd] sm:$0x1] %vm430_vm4, %v529_v0  ;;  %v592_v1 = vmul.f32 %v591_v46, %v2321_v48  ;;  %v606_v52 = vmul.f32 %v605_v49, %v2321_v48  ;;  %v620_v56 = vmul.f32 %v619_v53, %v2321_v48  ;;  %v817_v47 = vstv %s2418_s20  ;;  %s2487_s20 = sld [smem:[#allocation9 + $0x201]] }
 0x25d   : > { %v634_v59 = vmul.f32 %v633_v57, %v2321_v48  ;;  %v648_v63 = vmul.f32 %v647_v60, %v2321_v48  ;;  %v662_v8 = vmul.f32 %v661_v7, %v2321_v48 }
 0x25e   : > { %596 = vrot.lane.b32.xlu0 %v592_v1, %s2009_s10 }
 0x25f   : > { %v519_v50 = vpop.permute.xlu1 %518  ;;  %v549_v51 = vpop.permute.xlu0 %548  ;;  %v2362_v12 = vld [vmem:[#allocation2 + $0x1] sm:$0xff] }
 0x260   : > { %521 = vst.msk [vmem:[#allocation2 + $0xc] sm:$0x1] %vm430_vm4, %v519_v50  ;;  %551 = vst.msk [vmem:[#allocation2 + $0xf] sm:$0x1] %vm430_vm4, %v549_v51  ;;  %v684_v16 = vmul.f32 %v683_v15, %v2362_v12  ;;  %v698_v19 = vmul.f32 %v697_v18, %v2362_v12  ;;  %v712_v23 = vmul.f32 %v711_v21, %v2362_v12  ;;  %v2408_v36 = vld [vmem:[#allocation2 + $0x2] sm:$0xff] }
 0x261   : > { %v726_v26 = vmul.f32 %v725_v25, %v2362_v12  ;;  %v740_v31 = vmul.f32 %v739_v28, %v2362_v12  ;;  %v754_v34 = vmul.f32 %v753_v33, %v2362_v12  ;;  %v776_v42 = vmul.f32 %v775_v41, %v2408_v36 }
 0x262   : > { %610 = vrot.lane.b32.xlu0 %v606_v52, %s2010_s26  ;;  %v790_v6 = vmul.f32 %v789_v5, %v2408_v36  ;;  %v804_v11 = vmul.f32 %v803_v10, %v2408_v36  ;;  %v818_v0 = vmul.f32 %v817_v47, %v2408_v36 }
 0x263   : > { %v539_v54 = vpop.permute.xlu1 %538  ;;  %v569_v55 = vpop.permute.xlu0 %568 }
 0x264   : > { %541 = vst.msk [vmem:[#allocation2 + $0xe] sm:$0x1] %vm430_vm4, %v539_v54  ;;  %571 = vst.msk [vmem:[#allocation2 + $0x11] sm:$0x1] %vm430_vm4, %v569_v55 }
 0x266   : > { %624 = vrot.lane.b32.xlu0 %v620_v56, %s2011_s9  ;;  %v2454_v56 = vld [vmem:[#allocation2 + $0x3] sm:$0xff] }
 0x267   : > { %v559_v58 = vpop.permute.xlu1 %558 }
 0x268   : > { %561 = vst.msk [vmem:[#allocation2 + $0x10] sm:$0x1] %vm430_vm4, %v559_v58 }
 0x26a   : > { %638 = vrot.lane.b32.xlu0 %v634_v59, %s2012_s25 }
 0x26b   : > { %v579_v61 = vpop.permute.xlu1 %578  ;;  %v2350_v62 = vld [vmem:[#allocation2 + $0x8] sm:$0xff] }
 0x26c   : > { %581 = vst.msk [vmem:[#allocation2 + $0x12] sm:$0x1] %vm430_vm4, %v579_v61  ;;  %v593_v3 = vmul.f32 %v591_v46, %v2350_v62  ;;  %v607_v9 = vmul.f32 %v605_v49, %v2350_v62  ;;  %v621_v17 = vmul.f32 %v619_v53, %v2350_v62  ;;  %v635_v20 = vmul.f32 %v633_v57, %v2350_v62 }
 0x26d   : > { %v649_v24 = vmul.f32 %v647_v60, %v2350_v62  ;;  %v663_v27 = vmul.f32 %v661_v7, %v2350_v62  ;;  %v831_v49 = vstv %s2425_s30  ;;  %v845_v53 = vstv %s2432_s8  ;;  %s2494_s30 = sld [smem:[#allocation9 + $0x202]]  ;;  %s2503_s8 = sld [smem:[#allocation9 + $0x203]] }
 0x26e   : > { %652 = vrot.lane.b32.xlu0 %v648_v63, %s2013_s12  ;;  %598 = vrot.lane.b32.xlu1 %v593_v3, %s2009_s10  ;;  %v832_v51 = vmul.f32 %v831_v49, %v2408_v36  ;;  %v846_v54 = vmul.f32 %v845_v53, %v2408_v36  ;;  %v867_v57 = vstv %s2441_s14  ;;  %v881_v60 = vstv %s2448_s22  ;;  %s2510_s14 = sld [smem:[#allocation9 + $0x204]]  ;;  %s2517_s22 = sld [smem:[#allocation9 + $0x205]] }
 0x26f   : > { %v2393_v30 = vld [vmem:[#allocation2 + $0x9] sm:$0xff]  ;;  %v868_v58 = vmul.f32 %v867_v57, %v2454_v56  ;;  %v882_v61 = vmul.f32 %v881_v60, %v2454_v56  ;;  %v895_v3 = vstv %s2457_s23  ;;  %s2523_s23 = sld [smem:[#allocation9]]  ;;  %vm2783_vm4 = vcmp.lt.s32.totalorder %v399_v13, 96 }
 0x270   : > { %v685_v32 = vmul.f32 %v683_v15, %v2393_v30  ;;  %v699_v35 = vmul.f32 %v697_v18, %v2393_v30  ;;  %v713_v14 = vmul.f32 %v711_v21, %v2393_v30  ;;  %v727_v45 = vmul.f32 %v725_v25, %v2393_v30  ;;  %v2439_v50 = vld [vmem:[#allocation2 + $0xa] sm:$0xff] }
 0x271   : > { %v741_v46 = vmul.f32 %v739_v28, %v2393_v30  ;;  %v755_v1 = vmul.f32 %v753_v33, %v2393_v30  ;;  %v777_v52 = vmul.f32 %v775_v41, %v2439_v50  ;;  %v791_v55 = vmul.f32 %v789_v5, %v2439_v50  ;;  %v2500_v25 = vld [vmem:[#allocation2 + $0x4] sm:$0xff] }
 0x272   : > { %666 = vrot.lane.b32.xlu0 %v662_v8, %s2014_s13  ;;  %612 = vrot.lane.b32.xlu1 %v607_v9, %s2010_s26  ;;  %v805_v59 = vmul.f32 %v803_v10, %v2439_v50  ;;  %v819_v63 = vmul.f32 %v817_v47, %v2439_v50  ;;  %v896_v7 = vmul.f32 %v895_v3, %v2454_v56  ;;  %v909_v9 = vstv %s2464_s5  ;;  %s2526_s5 = sld [smem:[#allocation9 + $0x206]] }
 0x273   : > { %v833_v8 = vmul.f32 %v831_v49, %v2439_v50  ;;  %v910_v15 = vmul.f32 %v909_v9, %v2454_v56  ;;  %v2485_v18 = vld [vmem:[#allocation2 + $0xb] sm:$0xff]  ;;  %v937_v21 = vstv %s2478_s29  ;;  %s2543_s29 = sld [smem:[#allocation9 + $0x282]] }
 0x274   : > { %v897_v28 = vmul.f32 %v895_v3, %v2485_v18  ;;  %v911_v33 = vmul.f32 %v909_v9, %v2485_v18  ;;  %v939_v5 = vmul.f32 %v937_v21, %v2485_v18 }
 0x276   : > { %688 = vrot.lane.b32.xlu0 %v684_v16, %s2009_s10  ;;  %626 = vrot.lane.b32.xlu1 %v621_v17, %s2011_s9  ;;  %v847_v16 = vmul.f32 %v845_v53, %v2439_v50  ;;  %v923_v17 = vstv %s2471_s11  ;;  %s2535_s11 = sld [smem:[#allocation9 + $0x281]]  ;;  %v2550_v53 = vld [vmem:[#allocation2 + $0x5] sm:$0xff] }
 0x277   : > { %v925_v41 = vmul.f32 %v923_v17, %v2485_v18 }
 0x278   : > { %v1029_v47 = vstv %s2526_s5  ;;  %s2595_s5 = sld [smem:[#allocation9 + $0x302]] }
 0x279   : > { %v1030_v49 = vmul.f32 %v1029_v47, %v2500_v25 }
 0x27a   : > { %702 = vrot.lane.b32.xlu0 %v698_v19, %s2010_s26  ;;  %640 = vrot.lane.b32.xlu1 %v635_v20, %s2012_s25  ;;  %v924_v19 = vmul.f32 %v923_v17, %v2454_v56  ;;  %v869_v20 = vmul.f32 %v867_v57, %v2485_v18 }
 0x27e   : > { %716 = vrot.lane.b32.xlu0 %v712_v23, %s2011_s9  ;;  %654 = vrot.lane.b32.xlu1 %v649_v24, %s2013_s12  ;;  %v938_v23 = vmul.f32 %v937_v21, %v2454_v56  ;;  %v883_v24 = vmul.f32 %v881_v60, %v2485_v18 }
 0x282   : > { %730 = vrot.lane.b32.xlu0 %v726_v26, %s2012_s25  ;;  %668 = vrot.lane.b32.xlu1 %v663_v27, %s2014_s13  ;;  %v959_v26 = vstv %s2487_s20  ;;  %s2553_s20 = sld [smem:[#allocation9 + $0x283]] }
 0x283   : > { %v960_v27 = vmul.f32 %v959_v26, %v2500_v25 }
 0x286   : > { %744 = vrot.lane.b32.xlu0 %v740_v31, %s2013_s12  ;;  %690 = vrot.lane.b32.xlu1 %v685_v32, %s2009_s10  ;;  %v973_v31 = vstv %s2494_s30  ;;  %s2560_s30 = sld [smem:[#allocation9 + $0x284]] }
 0x287   : > { %v974_v32 = vmul.f32 %v973_v31, %v2500_v25 }
 0x28a   : > { %758 = vrot.lane.b32.xlu0 %v754_v34, %s2014_s13  ;;  %704 = vrot.lane.b32.xlu1 %v699_v35, %s2010_s26  ;;  %v987_v34 = vstv %s2503_s8  ;;  %s2567_s8 = sld [smem:[#allocation9 + $0x285]] }
 0x28b   : > { %v988_v35 = vmul.f32 %v987_v34, %v2500_v25 }
 0x28c   : > { %v1093_v17 = vstv %s2560_s30  ;;  %s2622_s30 = sld [smem:[#allocation9 + $0x100]] }
 0x28e   : > { %780 = vrot.lane.b32.xlu0 %v776_v42, %s2009_s10  ;;  %718 = vrot.lane.b32.xlu1 %v713_v14, %s2011_s9  ;;  %v1001_v42 = vstv %s2510_s14  ;;  %s2571_s14 = sld [smem:[#allocation9 + $0x80]] }
 0x28f   : > { %v1002_v14 = vmul.f32 %v1001_v42, %v2500_v25 }
 0x292   : > { %794 = vrot.lane.b32.xlu0 %v790_v6, %s2010_s26  ;;  %732 = vrot.lane.b32.xlu1 %v727_v45, %s2012_s25  ;;  %v1015_v6 = vstv %s2517_s22  ;;  %v2533_v45 = vld [vmem:[#allocation2 + $0xc] sm:$0xff]  ;;  %s2576_s22 = sld [smem:[#allocation9 + $0x286]] }
 0x293   : > { %v1016_v10 = vmul.f32 %v1015_v6, %v2500_v25 }
 0x296   : > { %808 = vrot.lane.b32.xlu0 %v804_v11, %s2011_s9  ;;  %746 = vrot.lane.b32.xlu1 %v741_v46, %s2013_s12  ;;  %v961_v11 = vmul.f32 %v959_v26, %v2533_v45  ;;  %v585_v46 = vstv %s2523_s23  ;;  %s2586_s23 = sld [smem:[#allocation9 + $0x301]] }
 0x29a   : > { %822 = vrot.lane.b32.xlu0 %v818_v0, %s2012_s25  ;;  %760 = vrot.lane.b32.xlu1 %v755_v1, %s2014_s13  ;;  %v586_v0 = vmul.f32 %v585_v46, %v2321_v48  ;;  %v989_v48 = vmul.f32 %v987_v34, %v2533_v45 }
 0x29e   : > { %836 = vrot.lane.b32.xlu0 %v832_v51, %s2013_s12  ;;  %782 = vrot.lane.b32.xlu1 %v777_v52, %s2009_s10  ;;  %v975_v51 = vmul.f32 %v973_v31, %v2533_v45  ;;  %v677_v31 = vstv %s2571_s14  ;;  %s2017_s14 = smov 48  }
 0x2a2   : > { %850 = vrot.lane.b32.xlu0 %v846_v54, %s2014_s13  ;;  %796 = vrot.lane.b32.xlu1 %v791_v55, %s2010_s26  ;;  %v1051_v54 = vstv %s2535_s11  ;;  %s2604_s11 = sld [smem:[#allocation9 + $0x303]] }
 0x2a3   : > { %v1052_v57 = vmul.f32 %v1051_v54, %v2550_v53 }
 0x2a6   : > { %872 = vrot.lane.b32.xlu0 %v868_v58, %s2009_s10  ;;  %810 = vrot.lane.b32.xlu1 %v805_v59, %s2011_s9  ;;  %v1065_v59 = vstv %s2543_s29  ;;  %s2611_s29 = sld [smem:[#allocation9 + $0x304]] }
 0x2aa   : > { %886 = vrot.lane.b32.xlu0 %v882_v61, %s2010_s26  ;;  %824 = vrot.lane.b32.xlu1 %v819_v63, %s2012_s25  ;;  %v1066_v61 = vmul.f32 %v1065_v59, %v2550_v53  ;;  %v1003_v63 = vmul.f32 %v1001_v42, %v2533_v45  ;;  %v678_v42 = vmul.f32 %v677_v31, %v2362_v12  ;;  %v1143_v12 = vstv %s2586_s23  ;;  %s2019_s23 = smov 80  }
 0x2ae   : > { %900 = vrot.lane.b32.xlu0 %v896_v7, %s2011_s9  ;;  %838 = vrot.lane.b32.xlu1 %v833_v8, %s2013_s12  ;;  %v1079_v7 = vstv %s2553_s20  ;;  %s2618_s20 = sld [smem:[#allocation9 + $0x305]] }
 0x2af   : > { %v1080_v9 = vmul.f32 %v1079_v7, %v2550_v53 }
 0x2b2   : > { %914 = vrot.lane.b32.xlu0 %v910_v15, %s2012_s25  ;;  %852 = vrot.lane.b32.xlu1 %v847_v16, %s2014_s13  ;;  %v1017_v15 = vmul.f32 %v1015_v6, %v2533_v45 }
 0x2b6   : > { %928 = vrot.lane.b32.xlu0 %v924_v19, %s2013_s12  ;;  %874 = vrot.lane.b32.xlu1 %v869_v20, %s2009_s10  ;;  %v587_v19 = vmul.f32 %v585_v46, %v2350_v62 }
 0x2ba   : > { %942 = vrot.lane.b32.xlu0 %v938_v23, %s2014_s13  ;;  %888 = vrot.lane.b32.xlu1 %v883_v24, %s2010_s26  ;;  %v1094_v23 = vmul.f32 %v1093_v17, %v2550_v53  ;;  %v1031_v24 = vmul.f32 %v1029_v47, %v2533_v45 }
 0x2be   : > { %964 = vrot.lane.b32.xlu0 %v960_v27, %s2009_s10  ;;  %902 = vrot.lane.b32.xlu1 %v897_v28, %s2011_s9  ;;  %v1107_v27 = vstv %s2567_s8  ;;  %v2584_v28 = vld [vmem:[#allocation2 + $0xd] sm:$0xff]  ;;  %s2628_s8 = sld [smem:[#allocation9 + $0x306]] }
 0x2bf   : > { %v1108_v34 = vmul.f32 %v1107_v27, %v2550_v53  ;;  %v1067_v47 = vmul.f32 %v1065_v59, %v2584_v28 }
 0x2c2   : > { %978 = vrot.lane.b32.xlu0 %v974_v32, %s2010_s26  ;;  %916 = vrot.lane.b32.xlu1 %v911_v33, %s2012_s25 }
 0x2c6   : > { %992 = vrot.lane.b32.xlu0 %v988_v35, %s2011_s9  ;;  %930 = vrot.lane.b32.xlu1 %v925_v41, %s2013_s12  ;;  %v1053_v35 = vmul.f32 %v1051_v54, %v2584_v28  ;;  %v1081_v54 = vmul.f32 %v1079_v7, %v2584_v28  ;;  %v1109_v7 = vmul.f32 %v1107_v27, %v2584_v28 }
 0x2ca   : > { %1006 = vrot.lane.b32.xlu0 %v1002_v14, %s2012_s25  ;;  %944 = vrot.lane.b32.xlu1 %v939_v5, %s2014_s13  ;;  %v1121_v5 = vstv %s2576_s22  ;;  %s2018_s22 = smov 64  }
 0x2cb   : > { %v1122_v46 = vmul.f32 %v1121_v5, %v2550_v53 }
 0x2ce   : > { %1020 = vrot.lane.b32.xlu0 %v1016_v10, %s2013_s12  ;;  %966 = vrot.lane.b32.xlu1 %v961_v11, %s2009_s10 }
 0x2d0   : > { %v597_v1 = vpop.permute.xlu0 %596 }
 0x2d1   : > { %v602_v52 = vadd.f32 %v597_v1, %v586_v0  ;;  %v2601_v1 = vld [vmem:[#allocation2 + $0x6] sm:$0xff] }
 0x2d2   : > { %1034 = vrot.lane.b32.xlu0 %v1030_v49, %s2014_s13  ;;  %980 = vrot.lane.b32.xlu1 %v975_v51, %s2010_s26 }
 0x2d4   : > { %v611_v55 = vpop.permute.xlu0 %610 }
 0x2d5   : > { %v616_v58 = vadd.f32 %v611_v55, %v602_v52  ;;  %v1144_v52 = vmul.f32 %v1143_v12, %v2601_v1 }
 0x2d6   : > { %1056 = vrot.lane.b32.xlu0 %v1052_v57, %s2009_s10  ;;  %994 = vrot.lane.b32.xlu1 %v989_v48, %s2011_s9  ;;  %v1157_v57 = vstv %s2595_s5  ;;  %s2020_s5 = smov 96  }
 0x2d7   : > { %v1158_v59 = vmul.f32 %v1157_v57, %v2601_v1 }
 0x2d8   : > { %v625_v60 = vpop.permute.xlu0 %624 }
 0x2d9   : > { %v630_v3 = vadd.f32 %v625_v60, %v616_v58  ;;  %v1095_v60 = vmul.f32 %v1093_v17, %v2584_v28  ;;  %v679_v17 = vmul.f32 %v677_v31, %v2393_v30  ;;  %v1199_v30 = vstv %s2618_s20  ;;  %v2635_v31 = vld [vmem:[#allocation2 + $0xe] sm:$0xff]  ;;  %s229_s20 = scalar_lea.vmem [#allocation10], %s1683_s7 }
 0x2da   : > { %1070 = vrot.lane.b32.xlu0 %v1066_v61, %s2010_s26  ;;  %1008 = vrot.lane.b32.xlu1 %v1003_v63, %s2012_s25  ;;  %v1171_v61 = vstv %s2604_s11  ;;  %s2021_s11 = smov 112  }
 0x2dc   : > { %v639_v8 = vpop.permute.xlu0 %638 }
 0x2dd   : > { %v644_v16 = vadd.f32 %v639_v8, %v630_v3 }
 0x2de   : > { %1084 = vrot.lane.b32.xlu0 %v1080_v9, %s2011_s9  ;;  %1022 = vrot.lane.b32.xlu1 %v1017_v15, %s2013_s12  ;;  %v1172_v15 = vmul.f32 %v1171_v61, %v2601_v1 }
 0x2e0   : > { %v599_v20 = vpop.permute.xlu1 %598  ;;  %v653_v21 = vpop.permute.xlu0 %652 }
 0x2e1   : > { %v603_v26 = vadd.f32 %v599_v20, %v587_v19  ;;  %v658_v32 = vadd.f32 %v653_v21, %v644_v16  ;;  %v1185_v20 = vstv %s2611_s29  ;;  %s1770_s29 = sshll.u32 %s2070_s19, 10  ;;  %s1577_s19 = scalar_lea.sflag [#allocation7], %s2176_s6 }
 0x2e2   : > { %1098 = vrot.lane.b32.xlu0 %v1094_v23, %s2012_s25  ;;  %1036 = vrot.lane.b32.xlu1 %v1031_v24, %s2014_s13  ;;  %v1123_v24 = vmul.f32 %v1121_v5, %v2584_v28 }
 0x2e4   : > { %v613_v62 = vpop.permute.xlu1 %612  ;;  %v667_v33 = vpop.permute.xlu0 %666 }
 0x2e5   : > { %v617_v41 = vadd.f32 %v613_v62, %v603_v26  ;;  %v672_v14 = vadd.f32 %v667_v33, %v658_v32  ;;  %v1186_v32 = vmul.f32 %v1185_v20, %v2601_v1  ;;  %v769_v33 = vstv %s2622_s30  ;;  %s1590_s30 = sshll.u32 %s229_s20, 4  ;;  %s2882_s30 = int_to_ptr.vmem [resolvable:$true] %s1590_s30 }
 0x2e6   : > { %1112 = vrot.lane.b32.xlu0 %v1108_v34, %s2013_s12  ;;  %1058 = vrot.lane.b32.xlu1 %v1053_v35, %s2009_s10  ;;  %v770_v5 = vmul.f32 %v769_v33, %v2408_v36  ;;  %s1923_s7 = scalar_lea.vmem %s2882_s30, 1024 }
 0x2e7   : > { %v680_v6 = vadd.f32 %v678_v42, %v672_v14  ;;  %v1200_v42 = vmul.f32 %v1199_v30, %v2601_v1  ;;  %v1145_v14 = vmul.f32 %v1143_v12, %v2635_v31  ;;  %p1924_p5 = scmp.ne.s32.totalorder %s2882_s30, %s1923_s7 }
 0x2e8   : > { %v627_v10 = vpop.permute.xlu1 %626  ;;  %v689_v11 = vpop.permute.xlu0 %688 }
 0x2e9   : > { %v631_v0 = vadd.f32 %v627_v10, %v617_v41  ;;  %v694_v63 = vadd.f32 %v689_v11, %v680_v6  ;;  %v1213_v10 = vstv %s2628_s8  ;;  %p1925_p8 = pnand %p1924_p5, %p2983_p12 }
 0x2ea   : > { %1126 = vrot.lane.b32.xlu0 %v1122_v46, %s2014_s13  ;;  %1072 = vrot.lane.b32.xlu1 %v1067_v47, %s2010_s26 }
 0x2eb   : > { %p1926_p9 = pneg %p1925_p8 }
 0x2ec   : > { %v641_v49 = vpop.permute.xlu1 %640  ;;  %v703_v51 = vpop.permute.xlu0 %702 }
 0x2ed   : > { %v645_v55 = vadd.f32 %v641_v49, %v631_v0  ;;  %v708_v16 = vadd.f32 %v703_v51, %v694_v63  ;;  %v1214_v0 = vmul.f32 %v1213_v10, %v2601_v1  ;;  %v1159_v49 = vmul.f32 %v1157_v57, %v2635_v31 }
 0x2ee   : > { %1148 = vrot.lane.b32.xlu0 %v1144_v52, %s2009_s10  ;;  %1086 = vrot.lane.b32.xlu1 %v1081_v54, %s2011_s9  ;;  %v1173_v52 = vmul.f32 %v1171_v61, %v2635_v31  ;;  %v1201_v61 = vmul.f32 %v1199_v30, %v2635_v31 }
 0x2f0   : > { %v655_v48 = vpop.permute.xlu1 %654  ;;  %v717_v58 = vpop.permute.xlu0 %716 }
 0x2f1   : > { %v659_v3 = vadd.f32 %v655_v48, %v645_v55  ;;  %v722_v21 = vadd.f32 %v717_v58, %v708_v16 }
 0x2f2   : > { %1162 = vrot.lane.b32.xlu0 %v1158_v59, %s2010_s26  ;;  %1100 = vrot.lane.b32.xlu1 %v1095_v60, %s2012_s25  ;;  %v1187_v59 = vmul.f32 %v1185_v20, %v2635_v31 }
 0x2f4   : > { %v669_v8 = vpop.permute.xlu1 %668  ;;  %v731_v9 = vpop.permute.xlu0 %730 }
 0x2f5   : > { %v673_v19 = vadd.f32 %v669_v8, %v659_v3  ;;  %v736_v62 = vadd.f32 %v731_v9, %v722_v21  ;;  %v1215_v21 = vmul.f32 %v1213_v10, %v2635_v31 }
 0x2f6   : > { %1176 = vrot.lane.b32.xlu0 %v1172_v15, %s2011_s9  ;;  %1114 = vrot.lane.b32.xlu1 %v1109_v7, %s2013_s12  ;;  %v771_v15 = vmul.f32 %v769_v33, %v2439_v50 }
 0x2f7   : > { %v681_v23 = vadd.f32 %v679_v17, %v673_v19 }
 0x2f8   : > { %v691_v26 = vpop.permute.xlu1 %690  ;;  %v745_v27 = vpop.permute.xlu0 %744 }
 0x2f9   : > { %v750_v34 = vadd.f32 %v745_v27, %v736_v62  ;;  %v695_v12 = vadd.f32 %v691_v26, %v681_v23 }
 0x2fa   : > { %1190 = vrot.lane.b32.xlu0 %v1186_v32, %s2012_s25  ;;  %1128 = vrot.lane.b32.xlu1 %v1123_v24, %s2014_s13 }
 0x2fc   : > { %v705_v35 = vpop.permute.xlu1 %704  ;;  %v759_v41 = vpop.permute.xlu0 %758 }
 0x2fd   : > { %v764_v6 = vadd.f32 %v759_v41, %v750_v34  ;;  %v709_v54 = vadd.f32 %v705_v35, %v695_v12 }
 0x2fe   : > { %1204 = vrot.lane.b32.xlu0 %v1200_v42, %s2013_s12  ;;  %1150 = vrot.lane.b32.xlu1 %v1145_v14, %s2009_s10  ;;  %s2654_s10 = sld [smem:[#allocation9 + $0x180]] }
 0x2ff   : > { %v772_v11 = vadd.f32 %v770_v5, %v764_v6 }
 0x300   : > { %v719_v46 = vpop.permute.xlu1 %718  ;;  %v781_v47 = vpop.permute.xlu0 %780 }
 0x301   : > { %v723_v55 = vadd.f32 %v719_v46, %v709_v54  ;;  %v786_v57 = vadd.f32 %v781_v47, %v772_v11 }
 0x302   : > { %1218 = vrot.lane.b32.xlu0 %v1214_v0, %s2014_s13  ;;  %1164 = vrot.lane.b32.xlu1 %v1159_v49, %s2010_s26  ;;  %s2663_s26 = sld [smem:[#allocation9 + $0x200]] }
 0x304   : > { %v733_v51 = vpop.permute.xlu1 %732  ;;  %v795_v36 = vpop.permute.xlu0 %794  ;;  %v861_v24 = vstv %s2654_s10 }
 0x305   : > { %v737_v60 = vadd.f32 %v733_v51, %v723_v55  ;;  %v800_v8 = vadd.f32 %v795_v36, %v786_v57  ;;  %v862_v30 = vmul.f32 %v861_v24, %v2454_v56  ;;  %v863_v51 = vmul.f32 %v861_v24, %v2485_v18 }
 0x306   : > { %1178 = vrot.lane.b32.xlu1 %v1173_v52, %s2011_s9  ;;  %s2668_s9 = sld [smem:[#allocation9 + $0x280]] }
 0x308   : > { %v747_v48 = vpop.permute.xlu1 %746  ;;  %v809_v58 = vpop.permute.xlu0 %808 }
 0x309   : > { %v751_v63 = vadd.f32 %v747_v48, %v737_v60  ;;  %v814_v16 = vadd.f32 %v809_v58, %v800_v8  ;;  %v953_v58 = vstv %s2663_s26  ;;  %s2876_s26 = scalar_lea.hbm %s2931_s4, %s1770_s29 }
 0x30a   : > { %1192 = vrot.lane.b32.xlu1 %v1187_v59, %s2012_s25  ;;  %s2673_s25 = sld [smem:[#allocation9 + $0x300]] }
 0x30c   : > { %v761_v3 = vpop.permute.xlu1 %760  ;;  %v823_v7 = vpop.permute.xlu0 %822 }
 0x30d   : > { %v765_v9 = vadd.f32 %v761_v3, %v751_v63  ;;  %v828_v23 = vadd.f32 %v823_v7, %v814_v16  ;;  %v954_v3 = vmul.f32 %v953_v58, %v2500_v25 }
 0x30e   : > { %1206 = vrot.lane.b32.xlu1 %v1201_v61, %s2013_s12  ;;  %s2015_s12 = smov 16  }
 0x30f   : > { %v773_v17 = vadd.f32 %v771_v15, %v765_v9 }
 0x310   : > { %v783_v19 = vpop.permute.xlu1 %782  ;;  %v837_v20 = vpop.permute.xlu0 %836 }
 0x311   : > { %v842_v26 = vadd.f32 %v837_v20, %v828_v23  ;;  %v787_v35 = vadd.f32 %v783_v19, %v773_v17 }
 0x312   : > { %1220 = vrot.lane.b32.xlu1 %v1215_v21, %s2014_s13  ;;  %s2016_s13 = smov 32  }
 0x314   : > { %v797_v27 = vpop.permute.xlu1 %796  ;;  %v851_v32 = vpop.permute.xlu0 %850 }
 0x315   : > { %v856_v62 = vadd.f32 %v851_v32, %v842_v26  ;;  %v801_v14 = vadd.f32 %v797_v27, %v787_v35 }
 0x317   : > { %v864_v34 = vadd.f32 %v862_v30, %v856_v62  ;;  %v955_v62 = vmul.f32 %v953_v58, %v2533_v45 }
 0x318   : > { %v811_v50 = vpop.permute.xlu1 %810  ;;  %v873_v33 = vpop.permute.xlu0 %872 }
 0x319   : > { %v815_v5 = vadd.f32 %v811_v50, %v801_v14  ;;  %v878_v46 = vadd.f32 %v873_v33, %v864_v34 }
 0x31c   : > { %v825_v41 = vpop.permute.xlu1 %824  ;;  %v887_v42 = vpop.permute.xlu0 %886 }
 0x31d   : > { %v829_v11 = vadd.f32 %v825_v41, %v815_v5  ;;  %v892_v12 = vadd.f32 %v887_v42, %v878_v46  ;;  %v1045_v41 = vstv %s2668_s9  ;;  %s2022_s9 = smov [#allocation10]  }
 0x320   : > { %v839_v6 = vpop.permute.xlu1 %838  ;;  %v901_v10 = vpop.permute.xlu0 %900 }
 0x321   : > { %v843_v47 = vadd.f32 %v839_v6, %v829_v11  ;;  %v906_v36 = vadd.f32 %v901_v10, %v892_v12  ;;  %v1046_v10 = vmul.f32 %v1045_v41, %v2550_v53 }
 0x324   : > { %v853_v0 = vpop.permute.xlu1 %852  ;;  %v915_v49 = vpop.permute.xlu0 %914 }
 0x325   : > { %v857_v56 = vadd.f32 %v853_v0, %v843_v47  ;;  %v920_v48 = vadd.f32 %v915_v49, %v906_v36 }
 0x327   : > { %v865_v52 = vadd.f32 %v863_v51, %v857_v56 }
 0x328   : > { %v875_v54 = vpop.permute.xlu1 %874  ;;  %v929_v55 = vpop.permute.xlu0 %928 }
 0x329   : > { %v934_v59 = vadd.f32 %v929_v55, %v920_v48  ;;  %v879_v9 = vadd.f32 %v875_v54, %v865_v52 }
 0x32c   : > { %v889_v60 = vpop.permute.xlu1 %888  ;;  %v943_v57 = vpop.permute.xlu0 %942 }
 0x32d   : > { %v948_v63 = vadd.f32 %v943_v57, %v934_v59  ;;  %v893_v17 = vadd.f32 %v889_v60, %v879_v9  ;;  %v1047_v60 = vmul.f32 %v1045_v41, %v2584_v28 }
 0x32f   : > { %v956_v7 = vadd.f32 %v954_v3, %v948_v63 }
 0x330   : > { %v903_v61 = vpop.permute.xlu1 %902  ;;  %v965_v8 = vpop.permute.xlu0 %964 }
 0x331   : > { %v907_v18 = vadd.f32 %v903_v61, %v893_v17  ;;  %v970_v23 = vadd.f32 %v965_v8, %v956_v7  ;;  %v1137_v8 = vstv %s2673_s25  ;;  %s1927_s25 = sshll.u32 %s2022_s9, 4  ;;  %s1928_s25 = int_to_ptr.vmem [resolvable:$false] %s1927_s25 }
 0x332   : > { %p1930_p10 = scmp.lt.s32.totalorder %s2882_s30, %s1928_s25 }
 0x334   : > { %v917_v15 = vpop.permute.xlu1 %916  ;;  %v979_v16 = vpop.permute.xlu0 %978 }
 0x335   : > { %v921_v21 = vadd.f32 %v917_v15, %v907_v18  ;;  %v984_v32 = vadd.f32 %v979_v16, %v970_v23  ;;  %v1138_v18 = vmul.f32 %v1137_v8, %v2601_v1 }
 0x338   : > { %v931_v19 = vpop.permute.xlu1 %930  ;;  %v993_v20 = vpop.permute.xlu0 %992 }
 0x339   : > { %v935_v24 = vadd.f32 %v931_v19, %v921_v21  ;;  %v998_v30 = vadd.f32 %v993_v20, %v984_v32 }
 0x33c   : > { %v945_v26 = vpop.permute.xlu1 %944  ;;  %v1007_v27 = vpop.permute.xlu0 %1006 }
 0x33d   : > { %v949_v25 = vadd.f32 %v945_v26, %v935_v24  ;;  %v1012_v35 = vadd.f32 %v1007_v27, %v998_v30 }
 0x33f   : > { %v957_v34 = vadd.f32 %v955_v62, %v949_v25 }
 0x340   : > { %v967_v50 = vpop.permute.xlu1 %966  ;;  %v1021_v33 = vpop.permute.xlu0 %1020 }
 0x341   : > { %v1026_v42 = vadd.f32 %v1021_v33, %v1012_v35  ;;  %v971_v0 = vadd.f32 %v967_v50, %v957_v34 }
 0x344   : > { %v981_v14 = vpop.permute.xlu1 %980  ;;  %v1035_v5 = vpop.permute.xlu0 %1034 }
 0x345   : > { %v1040_v6 = vadd.f32 %v1035_v5, %v1026_v42  ;;  %v985_v56 = vadd.f32 %v981_v14, %v971_v0  ;;  %v1139_v42 = vmul.f32 %v1137_v8, %v2635_v31 }
 0x347   : > { %v1048_v11 = vadd.f32 %v1046_v10, %v1040_v6 }
 0x348   : > { %v995_v46 = vpop.permute.xlu1 %994  ;;  %v1057_v47 = vpop.permute.xlu0 %1056 }
 0x349   : > { %v999_v45 = vadd.f32 %v995_v46, %v985_v56  ;;  %v1062_v54 = vadd.f32 %v1057_v47, %v1048_v11 }
 0x34c   : > { %v1009_v49 = vpop.permute.xlu1 %1008  ;;  %v1071_v12 = vpop.permute.xlu0 %1070 }
 0x34d   : > { %v1013_v52 = vadd.f32 %v1009_v49, %v999_v45  ;;  %v1076_v59 = vadd.f32 %v1071_v12, %v1062_v54 }
 0x350   : > { %v1023_v51 = vpop.permute.xlu1 %1022  ;;  %v1085_v36 = vpop.permute.xlu0 %1084 }
 0x351   : > { %v1027_v55 = vadd.f32 %v1023_v51, %v1013_v52  ;;  %v1090_v57 = vadd.f32 %v1085_v36, %v1076_v59 }
 0x354   : > { %v1037_v48 = vpop.permute.xlu1 %1036  ;;  %v1099_v58 = vpop.permute.xlu0 %1098 }
 0x355   : > { %v1041_v53 = vadd.f32 %v1037_v48, %v1027_v55  ;;  %v1104_v61 = vadd.f32 %v1099_v58, %v1090_v57 }
 0x357   : > { %v1049_v63 = vadd.f32 %v1047_v60, %v1041_v53 }
 0x358   : > { %v1059_v3 = vpop.permute.xlu1 %1058  ;;  %v1113_v7 = vpop.permute.xlu0 %1112 }
 0x359   : > { %v1118_v9 = vadd.f32 %v1113_v7, %v1104_v61  ;;  %v1063_v23 = vadd.f32 %v1059_v3, %v1049_v63 }
 0x35c   : > { %v1073_v15 = vpop.permute.xlu1 %1072  ;;  %v1127_v16 = vpop.permute.xlu0 %1126 }
 0x35d   : > { %v1132_v17 = vadd.f32 %v1127_v16, %v1118_v9  ;;  %v1077_v27 = vadd.f32 %v1073_v15, %v1063_v23 }
 0x35f   : > { %v1140_v19 = vadd.f32 %v1138_v18, %v1132_v17 }
 0x360   : > { %v1087_v20 = vpop.permute.xlu1 %1086  ;;  %v1149_v21 = vpop.permute.xlu0 %1148 }
 0x361   : > { %v1091_v28 = vadd.f32 %v1087_v20, %v1077_v27  ;;  %v1154_v30 = vadd.f32 %v1149_v21, %v1140_v19 }
 0x364   : > { %v1101_v24 = vpop.permute.xlu1 %1100  ;;  %v1163_v26 = vpop.permute.xlu0 %1162 }
 0x365   : > { %v1105_v62 = vadd.f32 %v1101_v24, %v1091_v28  ;;  %v1168_v35 = vadd.f32 %v1163_v26, %v1154_v30 }
 0x368   : > { %v1115_v32 = vpop.permute.xlu1 %1114  ;;  %v1177_v25 = vpop.permute.xlu0 %1176 }
 0x369   : > { %v1119_v34 = vadd.f32 %v1115_v32, %v1105_v62  ;;  %v1182_v1 = vadd.f32 %v1177_v25, %v1168_v35 }
 0x36c   : > { %v1129_v50 = vpop.permute.xlu1 %1128  ;;  %v1191_v33 = vpop.permute.xlu0 %1190 }
 0x36d   : > { %v1133_v41 = vadd.f32 %v1129_v50, %v1119_v34  ;;  %v1196_v10 = vadd.f32 %v1191_v33, %v1182_v1 }
 0x36f   : > { %v1141_v14 = vadd.f32 %v1139_v42, %v1133_v41 }
 0x370   : > { %v1151_v5 = vpop.permute.xlu1 %1150  ;;  %v1205_v6 = vpop.permute.xlu0 %1204 }
 0x371   : > { %v1210_v11 = vadd.f32 %v1205_v6, %v1196_v10  ;;  %v1155_v45 = vadd.f32 %v1151_v5, %v1141_v14 }
 0x374   : > { %v1165_v46 = vpop.permute.xlu1 %1164  ;;  %v1219_v47 = vpop.permute.xlu0 %1218 }
 0x375   : > { %v1224_v0 = vadd.f32 %v1219_v47, %v1210_v11  ;;  %v1169_v36 = vadd.f32 %v1165_v46, %v1155_v45 }
 0x377   : > { %v1226_v49 = vsub.f32 0.0, %v1224_v0 }
 0x378   : > { %v1179_v12 = vpop.permute.xlu1 %1178 }
 0x379   : > { %v1228_v56 = vmul.f32 1.442695, %v1226_v49  ;;  %v1183_v52 = vadd.f32 %v1179_v12, %v1169_v36 }
 0x37b   : > { %1870 = vpow2.f32 %v1228_v56 }
 0x37c   : > { %v1193_v51 = vpop.permute.xlu1 %1192 }
 0x37d   : > { %v1197_v55 = vadd.f32 %v1193_v51, %v1183_v52  ;;  %v2965_v52 = vmov 0 }
 0x37e   : > { %v2966_v52 = vsel %vm2764_vm1, 4294967295, %v2965_v52  ;;  %vm2826_vm1 = vcmp.lt.s32.totalorder %v399_v13, 128 }
 0x37f   : > { %vm2981_vm10 = vnez %v2966_v52 }
 0x380   : > { %v1207_v54 = vpop.permute.xlu1 %1206  ;;  %vm2982_vm11 = vmand %vm2759_vm0, %vm2981_vm10 }
 0x381   : > { %v1211_v31 = vadd.f32 %v1207_v54, %v1197_v55 }
 0x384   : > { %v1221_v48 = vpop.permute.xlu1 %1220 }
 0x385   : > { %v1871_v58 = vpop.eup %1870  ;;  %v1225_v59 = vadd.f32 %v1221_v48, %v1211_v31 }
 0x386   : > { %v1232_v53 = vadd.f32 1.0, %v1871_v58 }
 0x387   : > { %v1227_v60 = vsub.f32 0.0, %v1225_v59 }
 0x388   : > { %1872 = vrcp.f32 %v1232_v53 }
 0x389   : > { %v1230_v57 = vmul.f32 1.442695, %v1227_v60 }
 0x38b   : > { %1874 = vpow2.f32 %v1230_v57 }
 0x392   : > { %v1873_v63 = vpop.eup %1872 }
 0x393   : > { %1239 = vst.msk [vmem:[#allocation4] sm:$0xff] %vm1238_vm5, %v1873_v63 }
 0x395   : > { %v1875_v3 = vpop.eup %1874 }
 0x396   : > { %v1233_v7 = vadd.f32 1.0, %v1875_v3 }
 0x398   : > { %1876 = vrcp.f32 %v1233_v7 }
 0x39a   : > { %v1241_v8 = vld [vmem:[#allocation4] sm:$0x1]  ;;  %v1750_v9 = vld.sshfl [vmem:[#allocation4 + $0x1] sm:$0x1 pattern:$0x75316420] }
 0x39b   : > { %v1260_v15 = vrot.slane %v1750_v9, %v2300_v29  ;;  %1244 = vst.msk [vmem:[#allocation3] sm:$0x1] %vm2681_vm6, %v1241_v8  ;;  %v1751_v16 = vld.sshfl [vmem:[#allocation4 + $0x2] sm:$0x1 pattern:$0x75316420] }
 0x39c   : > { %v1283_v17 = vrot.slane %v1751_v16, %v2300_v29  ;;  %v1752_v18 = vld.sshfl [vmem:[#allocation4 + $0x3] sm:$0x1 pattern:$0x75316420] }
 0x39d   : > { %1261 = vrot.lane.b32.xlu0 %v1260_v15, %s2015_s12  ;;  %v1306_v20 = vrot.slane %v1752_v18, %v2300_v29  ;;  %v1753_v21 = vld.sshfl [vmem:[#allocation4 + $0x4] sm:$0x1 pattern:$0x75316420]  ;;  %v1556_v18 = vsub.s32 1, %v2297_v22 }
 0x39e   : > { %v1329_v23 = vrot.slane %v1753_v21, %v2300_v29  ;;  %v1754_v24 = vld.sshfl [vmem:[#allocation4 + $0x5] sm:$0x1 pattern:$0x75316420] }
 0x39f   : > { %v1352_v32 = vrot.slane %v1754_v24, %v2300_v29  ;;  %v1755_v25 = vld.sshfl [vmem:[#allocation4 + $0x6] sm:$0x1 pattern:$0x75316420] }
 0x3a0   : > { %v1375_v34 = vrot.slane %v1755_v25, %v2300_v29  ;;  %v1756_v50 = vld.sshfl [vmem:[#allocation4 + $0x7] sm:$0x1 pattern:$0x75316420] }
 0x3a1   : > { %1284 = vrot.lane.b32.xlu0 %v1283_v17, %s2016_s13  ;;  %v1398_v41 = vrot.slane %v1756_v50, %v2300_v29  ;;  %v1552_v17 = vsub.s32 0, %v2297_v22 }
 0x3a2   : > { %v1877_v19 = vpop.eup %1876 }
 0x3a3   : > { %1240 = vst.msk [vmem:[#allocation4 + $0x8] sm:$0xff] %vm1238_vm5, %v1877_v19  ;;  %vm1358_vm5 = vmand %vm2778_vm3, %vm2783_vm4 }
 0x3a5   : > { %1307 = vrot.lane.b32.xlu0 %v1306_v20, %s2017_s14 }
 0x3a9   : > { %1330 = vrot.lane.b32.xlu0 %v1329_v23, %s2018_s22 }
 0x3aa   : > { %v1406_v26 = vld [vmem:[#allocation4 + $0x8] sm:$0x1]  ;;  %v1757_v27 = vld.sshfl [vmem:[#allocation4 + $0x9] sm:$0x1 pattern:$0x75316420] }
 0x3ab   : > { %v1423_v28 = vrot.slane %v1757_v27, %v2300_v29  ;;  %1407 = vst.msk [vmem:[#allocation3 + $0x1] sm:$0x1] %vm2681_vm6, %v1406_v26  ;;  %v1758_v62 = vld.sshfl [vmem:[#allocation4 + $0xa] sm:$0x1 pattern:$0x75316420] }
 0x3ac   : > { %v1443_v30 = vrot.slane %v1758_v62, %v2300_v29  ;;  %v1759_v33 = vld.sshfl [vmem:[#allocation4 + $0xb] sm:$0x1 pattern:$0x75316420]  ;;  %vm2797_vm6 = vcmp.ge.s32.totalorder %v399_v13, 96 }
 0x3ad   : > { %1424 = vrot.lane.b32.xlu1 %v1423_v28, %s2015_s12  ;;  %1353 = vrot.lane.b32.xlu0 %v1352_v32, %s2019_s23  ;;  %v1463_v35 = vrot.slane %v1759_v33, %v2300_v29  ;;  %v1760_v42 = vld.sshfl [vmem:[#allocation4 + $0xc] sm:$0x1 pattern:$0x75316420] }
 0x3ae   : > { %v1483_v1 = vrot.slane %v1760_v42, %v2300_v29  ;;  %v1761_v14 = vld.sshfl [vmem:[#allocation4 + $0xd] sm:$0x1 pattern:$0x75316420] }
 0x3af   : > { %v1503_v5 = vrot.slane %v1761_v14, %v2300_v29  ;;  %v1762_v6 = vld.sshfl [vmem:[#allocation4 + $0xe] sm:$0x1 pattern:$0x75316420] }
 0x3b0   : > { %v1523_v10 = vrot.slane %v1762_v6, %v2300_v29  ;;  %v1763_v11 = vld.sshfl [vmem:[#allocation4 + $0xf] sm:$0x1 pattern:$0x75316420] }
 0x3b1   : > { %1444 = vrot.lane.b32.xlu1 %v1443_v30, %s2016_s13  ;;  %1376 = vrot.lane.b32.xlu0 %v1375_v34, %s2020_s5  ;;  %v1543_v46 = vrot.slane %v1763_v11, %v2300_v29  ;;  %s1929_s13 = scalar_lea.vmem %s1928_s25, 2048 }
 0x3b2   : > { %p1931_p1 = scmp.lt.s32.totalorder %s1929_s13, %s1923_s7 }
 0x3b4   : > { %p1932_p4 = por %p1931_p1, %p1930_p10 }
 0x3b5   : > { %1464 = vrot.lane.b32.xlu1 %v1463_v35, %s2017_s14  ;;  %1399 = vrot.lane.b32.xlu0 %v1398_v41, %s2021_s11 }
 0x3b6   : > { %p1933_p11 = pnand %p1932_p4, %p1926_p9 }
 0x3b9   : > { %1484 = vrot.lane.b32.xlu1 %v1483_v1, %s2018_s22 }
 0x3bd   : > { %1504 = vrot.lane.b32.xlu1 %v1503_v5, %s2019_s23 }
 0x3c1   : > { %1524 = vrot.lane.b32.xlu1 %v1523_v10, %s2020_s5 }
 0x3c5   : > { %1544 = vrot.lane.b32.xlu1 %v1543_v46, %s2021_s11 }
 0x40f   : > { %v1262_v12 = vpop.permute.xlu0 %1261 }
 0x410   : > { %1267 = vst.msk [vmem:[#allocation3] sm:$0x1] %vm1266_vm9, %v1262_v12 }
 0x413   : > { %v1285_v51 = vpop.permute.xlu0 %1284 }
 0x414   : > { %1290 = vst.msk [vmem:[#allocation3] sm:$0x1] %vm2937_vm12, %v1285_v51  ;;  %vm2821_vm12 = vcmp.ge.s32.totalorder %v399_v13, 112 }
 0x415   : > { %vm1404_vm8 = vmand %vm2821_vm12, %vm2826_vm1 }
 0x417   : > { %v1308_v54 = vpop.permute.xlu0 %1307 }
 0x418   : > { %1313 = vst.msk [vmem:[#allocation3] sm:$0x1] %vm2935_vm15, %v1308_v54  ;;  %vm2802_vm15 = vcmp.lt.s32.totalorder %v399_v13, 112 }
 0x41b   : > { %v1331_v48 = vpop.permute.xlu0 %1330 }
 0x41c   : > { %1336 = vst.msk [vmem:[#allocation3] sm:$0x1] %vm2936_vm2, %v1331_v48  ;;  %vm1381_vm2 = vmand %vm2797_vm6, %vm2802_vm15 }
 0x41f   : > { %v1425_v53 = vpop.permute.xlu1 %1424  ;;  %v1354_v60 = vpop.permute.xlu0 %1353 }
 0x420   : > { %1427 = vst.msk [vmem:[#allocation3 + $0x1] sm:$0x1] %vm1266_vm9, %v1425_v53  ;;  %vm2980_vm9 = vmand %vm2740_vm13, %vm2745_vm14 }
 0x421   : > { %1359 = vst.msk [vmem:[#allocation3] sm:$0x1] %vm1358_vm5, %v1354_v60 }
 0x423   : > { %v1445_v3 = vpop.permute.xlu1 %1444  ;;  %v1377_v7 = vpop.permute.xlu0 %1376 }
 0x424   : > { %1447 = vst.msk [vmem:[#allocation3 + $0x1] sm:$0x1] %vm2979_vm7, %v1445_v3 }
 0x425   : > { %1382 = vst.msk [vmem:[#allocation3] sm:$0x1] %vm1381_vm2, %v1377_v7 }
 0x427   : > { %v1465_v13 = vpop.permute.xlu1 %1464  ;;  %v1400_v61 = vpop.permute.xlu0 %1399 }
 0x428   : > { %1467 = vst.msk [vmem:[#allocation3 + $0x1] sm:$0x1] %vm2980_vm9, %v1465_v13 }
 0x429   : > { %1405 = vst.msk [vmem:[#allocation3] sm:$0x1] %vm1404_vm8, %v1400_v61 }
 0x42b   : > { %v1485_v8 = vpop.permute.xlu1 %1484 }
 0x42c   : > { %1487 = vst.msk [vmem:[#allocation3 + $0x1] sm:$0x1] %vm2982_vm11, %v1485_v8 }
 0x42f   : > { %v1505_v9 = vpop.permute.xlu1 %1504 }
 0x430   : > { %1507 = vst.msk [vmem:[#allocation3 + $0x1] sm:$0x1] %vm1358_vm5, %v1505_v9 }
 0x433   : > { %v1525_v15 = vpop.permute.xlu1 %1524 }
 0x434   : > { %1527 = vst.msk [vmem:[#allocation3 + $0x1] sm:$0x1] %vm1381_vm2, %v1525_v15 }
 0x437   : > { %v1545_v16 = vpop.permute.xlu1 %1544 }
 0x438   : > { %1547 = vst.msk [vmem:[#allocation3 + $0x1] sm:$0x1] %vm1404_vm8, %v1545_v16 }
 0x43f   : > { %v1548_v19 = vld [vmem:[#allocation3] sm:$0x3] }
 0x440   : > { %v1553_v20 = vrot.slane %v1548_v19, %v1552_v17  ;;  %v1557_v21 = vrot.slane %v1548_v19, %v1556_v18 }
 0x442   : > { %v1560_v23 = vmul.f32 %v1553_v20, %v2263_v39  ;;  %v1561_v24 = vmul.f32 %v1557_v21, %v2266_v40  ;;  %v1562_v26 = vmul.f32 %v1553_v20, %v2257_v37  ;;  %v1563_v27 = vmul.f32 %v1557_v21, %v2260_v38 }
 0x443   : > { %v1564_v22 = vmul.f32 %v1553_v20, %v2279_v2  ;;  %v1565_v28 = vmul.f32 %v1557_v21, %v2282_v4  ;;  %v1566_v32 = vmul.f32 %v1553_v20, %v2269_v43  ;;  %v1567_v39 = vmul.f32 %v1557_v21, %v2272_v44 }
 0x444   : > { %1568 = vst [vmem:[%s229_s20] sm:$0xff] %v1560_v23  ;;  %1569 = vst [vmem:[%s229_s20 + $0x8] sm:$0xff] %v1561_v24 }
 0x445   : > { %1570 = vst [vmem:[%s229_s20 + $0x10] sm:$0xff] %v1562_v26  ;;  %1571 = vst [vmem:[%s229_s20 + $0x18] sm:$0xff] %v1563_v27 }
 0x446   : > { %1572 = vst [vmem:[%s229_s20 + $0x20] sm:$0xff] %v1564_v22  ;;  %1573 = vst [vmem:[%s229_s20 + $0x28] sm:$0xff] %v1565_v28 }
 0x447   : > { %1574 = vst [vmem:[%s229_s20 + $0x30] sm:$0xff] %v1566_v32  ;;  %1575 = vst [vmem:[%s229_s20 + $0x38] sm:$0xff] %v1567_v39 }
 0x448   : > { %1936 = shalt.err (!%p1933_p11)
}
 0x449   : > { %s1937_s14 = scalar_lea.hbm %s2876_s26, 1024  ;;  %s1941_s5 = scalar_lea.hbm %s2931_s4, 2048 }
 0x44a   : > { %p1938_p0 = scmp.ne.s32.totalorder %s2876_s26, %s1937_s14  ;;  %p1942_p6 = scmp.lt.u32.totalorder %s2876_s26, %s2931_s4 }
 0x44b   : > { %p1943_p3 = scmp.lt.u32.totalorder %s1941_s5, %s1937_s14  ;;  %p1945_p5 = scmp.lt.u32.totalorder %s1937_s14, %s2876_s26 }
 0x44c   : > { %p1939_p2 = pnand %p1938_p0, %p2983_p12 }
 0x44d   : > { %p1944_p13 = por %p1943_p3, %p1942_p6 }
 0x44e   : > { %p1940_p7 = pneg %p1939_p2 }
 0x44f   : > { %p1946_p8 = por %p1945_p5, %p1944_p13 }
 0x451   : > { %p1947_p9 = pnand %p1946_p8, %p1940_p7 }
 0x453   : > { %1950 = shalt.err (!%p1947_p9)
}
 0x454   : > { %s2023_s20 = smov 256  }
 0x455   : > { %1777 = dma.vmem_to_hbm [thread:$0]  (%p2983_p12), %s2882_s30, 1024, %s2876_s26, %s1577_s19, %s2023_s20, %s2023_s20, %s2015_s12  }
 0x456 PF: > { %s1605_s8 = sand.u32 1, %s1981_s15   ;;  %p2984_p10 = scmp.ne.s32.totalorder %s2942_s28, 0 }
 0x457   : > { %p2985_p1 = scmp.ge.s32.totalorder %s1993_s18, 2  ;;  %s1606_s10 = scalar_lea.sflag [#allocation7], %s1605_s8 }
 0x459   : > { %p1788_p4 = pnand %p2985_p1, %p2984_p10 }
 0x45b   : > { %1976 = dma.done.wait (!%p1788_p4), %s1606_s10, 1024  }
 0x45c   : > { %1978 = vsyncadd (!%p1788_p4), %s1606_s10, 4294966272  ;;  %p18_p11 = scmp.ge.s32.totalorder %s2074_s21, 4   ;;  %s2986_s15 = smov %s1985_s16 }
 0x45d   : > { %s2987_s16 = smov %s1989_s17  ;;  %s2988_s17 = smov %s2086_s24 }
 0x45e   : > { %s2989_s18 = smov %s2074_s21  ;;  %20 = sbr.rel (!%p18_p11) target bundleno = 6 (0x6), region = 86 }
 0x465   :  { %1611 = vsyncpa [#allocation6], 1 }
 0x466   :  { %1613 = vsyncpa [#allocation6 + $0x1], 1 }
 0x467   :  { %1614 = vsyncpa [#allocation7], 1 }
 0x468   :  { %1616 = vsyncpa [#allocation7 + $0x1], 1 }
 0x469   :  { %1617 = vsyncpa [#allocation8], 1 }
 0x46a   :  { %1619 = vsyncpa [#allocation8 + $0x1], 1 }

</bundles_post_ra>
